<compile_context>
chip_gen: v7x
topology: tpu7x:2x2x1
jax: 0.10.0
libtpu: 0.0.40
codegen_flags: <defaults>
</compile_context>

<pallas_src>
import functools

import jax
import jax.numpy as jnp
from jax.experimental import pallas as pl


# ----------------------------------------------------------------------------
# Fused kernel: MLP -> (hoisted gi) -> T-step bi-GRU recurrence -> fc_out
# ----------------------------------------------------------------------------
def fused_kernel(x_ref, w1_ref, b1_ref, w2_ref, b2_ref,
                 wih_ref, bih_ref, whh_ref, bhh_ref,
                 wout_ref, bout_ref,
                 out_ref, penult_ref, *, T, H):
    # ---- MLP: fc1 -> relu -> fc2 -> relu (dropout = identity in eval) ----
    x = x_ref[...].astype(jnp.float32)
    h1 = jnp.maximum(
        jnp.dot(x, w1_ref[...], preferred_element_type=jnp.float32) + b1_ref[...], 0.0)
    penult = jnp.maximum(
        jnp.dot(h1, w2_ref[...], preferred_element_type=jnp.float32) + b2_ref[...], 0.0)
    penult_ref[...] = penult.astype(penult_ref.dtype)

    B = penult.shape[0]

    # ---- hoisted, time-invariant input gates for BOTH directions (one matmul) ----
    # column layout: [r_f | r_b | z_f | z_b | n_f | n_b], each H wide
    gi = jnp.dot(penult, wih_ref[...], preferred_element_type=jnp.float32) + bih_ref[...]
    gi_rz = gi[:, : 4 * H]
    gi_n = gi[:, 4 * H:]

    whh = whh_ref[...]          # (2H, 6H) block-diagonal over directions
    bhh = bhh_ref[...]          # (1, 6H)

    # ---- T-step recurrence, both directions carried in one (B, 2H) state ----
    h_both = jnp.zeros((B, 2 * H), jnp.float32)   # [h_forward | h_backward]
    h_hist = []
    for _ in range(T):  # T is small & static: fully unrolled for the scheduler
        gh = jnp.dot(h_both, whh, preferred_element_type=jnp.float32) + bhh
        rz = jax.nn.sigmoid(gi_rz + gh[:, : 4 * H])
        r = rz[:, : 2 * H]
        z = rz[:, 2 * H:]
        n = jnp.tanh(gi_n + r * gh[:, 4 * H:])
        h_both = (1.0 - z) * n + z * h_both
        h_hist.append(h_both)

    # ---- time-align the two directions and apply fc_out in-kernel ----
    # PyTorch bidirectional output at time t = [h_fwd after t+1 steps | h_bwd after T-t steps]
    dec_rows = []
    for t in range(T):
        h_f = h_hist[t][:, :H]
        h_b = h_hist[T - 1 - t][:, H:]
        dec_rows.append(jnp.concatenate([h_f, h_b], axis=-1))     # (B, 2H)
    dec = jnp.stack(dec_rows, axis=1)                             # (B, T, 2H)

    out = (jnp.dot(dec.reshape(B * T, 2 * H), wout_ref[...],
                   preferred_element_type=jnp.float32) + bout_ref[...])
    out_ref[...] = out.reshape(B, T, -1).astype(out_ref.dtype)    # lane-dense V store


# ----------------------------------------------------------------------------
# Parameter packing (pure JAX glue, tiny): fold both GRU directions into
#   wih_p (H, 6H), bih_p (1, 6H), whh_p (2H, 6H) block-diag, bhh_p (1, 6H)
# with gate/column layout [r_f | r_b | z_f | z_b | n_f | n_b].
# ----------------------------------------------------------------------------
def pack_gru_params(p):
    H = p["w2"].shape[0]

    def split3(w):  # (..., 3H) -> r, z, n  (PyTorch gate order)
        return w[..., :H], w[..., H:2 * H], w[..., 2 * H:]

    rf, zf, nf = split3(p["wih_f"])
    rb, zb, nb = split3(p["wih_b"])
    wih_p = jnp.concatenate([rf, rb, zf, zb, nf, nb], axis=1)           # (H, 6H)

    brf, bzf, bnf = split3(p["bih_f"])
    brb, bzb, bnb = split3(p["bih_b"])
    bih_p = jnp.concatenate([brf, brb, bzf, bzb, bnf, bnb], axis=1)     # (1, 6H)

    hrf, hzf, hnf = split3(p["whh_f"])
    hrb, hzb, hnb = split3(p["whh_b"])
    Z = jnp.zeros((H, H), jnp.float32)
    whh_p = jnp.concatenate([
        jnp.concatenate([hrf, Z, hzf, Z, hnf, Z], axis=1),              # rows: h_f
        jnp.concatenate([Z, hrb, Z, hzb, Z, hnb], axis=1),              # rows: h_b
    ], axis=0)                                                          # (2H, 6H)

    bhrf, bhzf, bhnf = split3(p["bhh_f"])
    bhrb, bhzb, bhnb = split3(p["bhh_b"])
    bhh_p = jnp.concatenate([bhrf, bhrb, bhzf, bhzb, bhnf, bhnb], axis=1)  # (1, 6H)

    return wih_p, bih_p, whh_p, bhh_p


# ----------------------------------------------------------------------------
# Full model forward: one fused pallas_call
# ----------------------------------------------------------------------------
def model_forward(x, target_sequence, params):
    p = params
    B = x.shape[0]
    T = target_sequence.shape[1]
    H = p["w2"].shape[0]
    V = p["w_out"].shape[1]

    wih_p, bih_p, whh_p, bhh_p = pack_gru_params(p)

    args = (x, p["w1"], p["b1"], p["w2"], p["b2"],
            wih_p, bih_p, whh_p, bhh_p, p["w_out"], p["b_out"])

    def full_spec(a):
        n = a.ndim
        return pl.BlockSpec(a.shape, lambda *_: (0,) * n)

    kernel = functools.partial(fused_kernel, T=T, H=H)

    output, penult = pl.pallas_call(
        kernel,
        out_shape=(jax.ShapeDtypeStruct((B, T, V), jnp.float32),
                   jax.ShapeDtypeStruct((B, H), jnp.float32)),
        in_specs=[full_spec(a) for a in args],
        out_specs=(pl.BlockSpec((B, T, V), lambda *_: (0, 0, 0)),
                   pl.BlockSpec((B, H), lambda *_: (0, 0))),
    )(*args)
    return output, penult


# ----------------------------------------------------------------------------
# Pure-JAX reference (for correctness check)
# ----------------------------------------------------------------------------
def reference_forward(x, target_sequence, p):
    h1 = jax.nn.relu(x @ p["w1"] + p["b1"][0])
    penult = jax.nn.relu(h1 @ p["w2"] + p["b2"][0])
    B, H = penult.shape
    T = target_sequence.shape[1]

    def run_dir(wih, whh, bih, bhh):
        def step(h, _):
            gi = penult @ wih + bih[0]
            gh = h @ whh + bhh[0]
            r = jax.nn.sigmoid(gi[:, :H] + gh[:, :H])
            z = jax.nn.sigmoid(gi[:, H:2 * H] + gh[:, H:2 * H])
            n = jnp.tanh(gi[:, 2 * H:] + r * gh[:, 2 * H:])
            h_new = (1.0 - z) * n + z * h
            return h_new, h_new
        _, hs = jax.lax.scan(step, jnp.zeros((B, H), jnp.float32), None, length=T)
        return hs  # (T, B, H)

    hf = run_dir(p["wih_f"], p["whh_f"], p["bih_f"], p["bhh_f"])
    hb = run_dir(p["wih_b"], p["whh_b"], p["bih_b"], p["bhh_b"])[::-1]
    dec = jnp.transpose(jnp.concatenate([hf, hb], axis=-1), (1, 0, 2))  # (B,T,2H)
    out = dec @ p["w_out"] + p["b_out"][0]
    return out, penult


# ----------------------------------------------------------------------------
def init_params(key, activation_dim, hidden_dim, vocab_size):
    ks = jax.random.split(key, 16)
    H = hidden_dim
    s_fc1 = 1.0 / jnp.sqrt(activation_dim)
    s_fc2 = 1.0 / jnp.sqrt(H)
    s_gru = 1.0 / jnp.sqrt(H)
    s_out = 1.0 / jnp.sqrt(2 * H)
    u = lambda k, shape, s: jax.random.uniform(k, shape, jnp.float32, -s, s)
    return {
        # Linear weights stored transposed for x @ W
        "w1": u(ks[0], (activation_dim, H), s_fc1), "b1": u(ks[1], (1, H), s_fc1),
        "w2": u(ks[2], (H, H), s_fc2),              "b2": u(ks[3], (1, H), s_fc2),
        # GRU weights: (input, 3H) / (hidden, 3H), gate order r,z,n (PyTorch)
        "wih_f": u(ks[4], (H, 3 * H), s_gru), "whh_f": u(ks[5], (H, 3 * H), s_gru),
        "bih_f": u(ks[6], (1, 3 * H), s_gru), "bhh_f": u(ks[7], (1, 3 * H), s_gru),
        "wih_b": u(ks[8], (H, 3 * H), s_gru), "whh_b": u(ks[9], (H, 3 * H), s_gru),
        "bih_b": u(ks[10], (1, 3 * H), s_gru), "bhh_b": u(ks[11], (1, 3 * H), s_gru),
        "w_out": u(ks[12], (2 * H, vocab_size), s_out),
        "b_out": u(ks[13], (1, vocab_size), s_out),
    }


if __name__ == "__main__":
    B, ACT_DIM, HIDDEN, VOCAB, T = 2, 32, 32, 128, 8

    key = jax.random.PRNGKey(0)
    kx, kt, kp = jax.random.split(key, 3)
    x = jax.random.normal(kx, (B, ACT_DIM), jnp.float32)
    target_sequence = jax.random.randint(kt, (B, T), 0, VOCAB)
    params = init_params(kp, ACT_DIM, HIDDEN, VOCAB)

    fwd = jax.jit(functools.partial(model_forward, params=params))
    output, penult = fwd(x, target_sequence)
    jax.block_until_ready((output, penult))

    ref_out, ref_pen = reference_forward(x, target_sequence, params)
    assert output.shape == (B, T, VOCAB) and penult.shape == (B, HIDDEN)
    assert jnp.allclose(output, ref_out, atol=1e-4, rtol=1e-4)
    assert jnp.allclose(penult, ref_pen, atol=1e-4, rtol=1e-4)

    # TODO(synk): dropout is a no-op in eval mode; training-mode stochastic dropout not implemented.
    print("KERNEL_OK")
</pallas_src>

<mosaic_0001>
module attributes {stable_mosaic.version = 11 : i64} {
  func.func @fused_kernel(%arg0: memref<2x32xf32, #tpu.memory_space<vmem>>, %arg1: memref<32x32xf32, #tpu.memory_space<vmem>>, %arg2: memref<1x32xf32, #tpu.memory_space<vmem>>, %arg3: memref<32x32xf32, #tpu.memory_space<vmem>>, %arg4: memref<1x32xf32, #tpu.memory_space<vmem>>, %arg5: memref<32x192xf32, #tpu.memory_space<vmem>>, %arg6: memref<1x192xf32, #tpu.memory_space<vmem>>, %arg7: memref<64x192xf32, #tpu.memory_space<vmem>>, %arg8: memref<1x192xf32, #tpu.memory_space<vmem>>, %arg9: memref<64x128xf32, #tpu.memory_space<vmem>>, %arg10: memref<1x128xf32, #tpu.memory_space<vmem>>, %arg11: memref<2x8x128xf32, #tpu.memory_space<vmem>>, %arg12: memref<2x32xf32, #tpu.memory_space<vmem>>) attributes {dimension_semantics = [], scalar_prefetch = 0 : i64, scratch_operands = 0 : i64, tpu.core_type = #tpu.core_type<tc>} {
    %c0 = arith.constant 0 : index
    %c0_0 = arith.constant 0 : index
    %0 = vector.load %arg0[%c0, %c0_0] : memref<2x32xf32, #tpu.memory_space<vmem>>, vector<2x32xf32>
    %c0_1 = arith.constant 0 : index
    %c0_2 = arith.constant 0 : index
    %1 = vector.load %arg1[%c0_1, %c0_2] : memref<32x32xf32, #tpu.memory_space<vmem>>, vector<32x32xf32>
    %cst = arith.constant dense<0.000000e+00> : vector<2x32xf32>
    %2 = tpu.matmul %0, %1, %cst {dimension_numbers = #tpu.dot_dimension_numbers<[1], [0], [0], [1], [0, 0, 1, 1], [], []>} : vector<2x32xf32>, vector<32x32xf32>, vector<2x32xf32> -> vector<2x32xf32>
    %c0_3 = arith.constant 0 : index
    %c0_4 = arith.constant 0 : index
    %3 = vector.load %arg2[%c0_3, %c0_4] : memref<1x32xf32, #tpu.memory_space<vmem>>, vector<1x32xf32>
    %4 = vector.broadcast %3 : vector<1x32xf32> to vector<2x32xf32>
    %5 = arith.addf %2, %4 : vector<2x32xf32>
    %cst_5 = arith.constant 0.000000e+00 : f32
    %6 = vector.broadcast %cst_5 : f32 to vector<2x32xf32>
    %7 = arith.maximumf %5, %6 : vector<2x32xf32>
    %c0_6 = arith.constant 0 : index
    %c0_7 = arith.constant 0 : index
    %8 = vector.load %arg3[%c0_6, %c0_7] : memref<32x32xf32, #tpu.memory_space<vmem>>, vector<32x32xf32>
    %cst_8 = arith.constant dense<0.000000e+00> : vector<2x32xf32>
    %9 = tpu.matmul %7, %8, %cst_8 {dimension_numbers = #tpu.dot_dimension_numbers<[1], [0], [0], [1], [0, 0, 1, 1], [], []>} : vector<2x32xf32>, vector<32x32xf32>, vector<2x32xf32> -> vector<2x32xf32>
    %c0_9 = arith.constant 0 : index
    %c0_10 = arith.constant 0 : index
    %10 = vector.load %arg4[%c0_9, %c0_10] : memref<1x32xf32, #tpu.memory_space<vmem>>, vector<1x32xf32>
    %11 = vector.broadcast %10 : vector<1x32xf32> to vector<2x32xf32>
    %12 = arith.addf %9, %11 : vector<2x32xf32>
    %cst_11 = arith.constant 0.000000e+00 : f32
    %13 = vector.broadcast %cst_11 : f32 to vector<2x32xf32>
    %14 = arith.maximumf %12, %13 : vector<2x32xf32>
    %c0_12 = arith.constant 0 : index
    %c0_13 = arith.constant 0 : index
    %15 = vector.load %arg12[%c0_12, %c0_13] : memref<2x32xf32, #tpu.memory_space<vmem>>, vector<2x32xf32>
    tpu.vector_store %arg12[%c0_12, %c0_13], %14 {strides = array<i32>} : memref<2x32xf32, #tpu.memory_space<vmem>>, vector<2x32xf32>,
    %c0_14 = arith.constant 0 : index
    %c0_15 = arith.constant 0 : index
    %16 = vector.load %arg5[%c0_14, %c0_15] : memref<32x192xf32, #tpu.memory_space<vmem>>, vector<32x192xf32>
    %cst_16 = arith.constant dense<0.000000e+00> : vector<2x192xf32>
    %17 = tpu.matmul %14, %16, %cst_16 {dimension_numbers = #tpu.dot_dimension_numbers<[1], [0], [0], [1], [0, 0, 1, 1], [], []>} : vector<2x32xf32>, vector<32x192xf32>, vector<2x192xf32> -> vector<2x192xf32>
    %c0_17 = arith.constant 0 : index
    %c0_18 = arith.constant 0 : index
    %18 = vector.load %arg6[%c0_17, %c0_18] : memref<1x192xf32, #tpu.memory_space<vmem>>, vector<1x192xf32>
    %19 = vector.broadcast %18 : vector<1x192xf32> to vector<2x192xf32>
    %20 = arith.addf %17, %19 : vector<2x192xf32>
    %21 = vector.extract_strided_slice %20 {offsets = [0, 0], sizes = [2, 128], strides = [1, 1]} : vector<2x192xf32> to vector<2x128xf32>
    %22 = vector.extract_strided_slice %20 {offsets = [0, 128], sizes = [2, 64], strides = [1, 1]} : vector<2x192xf32> to vector<2x64xf32>
    %c0_19 = arith.constant 0 : index
    %c0_20 = arith.constant 0 : index
    %23 = vector.load %arg7[%c0_19, %c0_20] : memref<64x192xf32, #tpu.memory_space<vmem>>, vector<64x192xf32>
    %c0_21 = arith.constant 0 : index
    %c0_22 = arith.constant 0 : index
    %24 = vector.load %arg8[%c0_21, %c0_22] : memref<1x192xf32, #tpu.memory_space<vmem>>, vector<1x192xf32>
    %cst_23 = arith.constant 0.000000e+00 : f32
    %25 = vector.broadcast %cst_23 : f32 to vector<2x64xf32>
    %cst_24 = arith.constant dense<0.000000e+00> : vector<2x192xf32>
    %26 = tpu.matmul %25, %23, %cst_24 {dimension_numbers = #tpu.dot_dimension_numbers<[1], [0], [0], [1], [0, 0, 1, 1], [], []>} : vector<2x64xf32>, vector<64x192xf32>, vector<2x192xf32> -> vector<2x192xf32>
    %27 = vector.broadcast %24 : vector<1x192xf32> to vector<2x192xf32>
    %28 = arith.addf %26, %27 : vector<2x192xf32>
    %29 = vector.extract_strided_slice %28 {offsets = [0, 0], sizes = [2, 128], strides = [1, 1]} : vector<2x192xf32> to vector<2x128xf32>
    %30 = arith.addf %21, %29 : vector<2x128xf32>
    %31 = arith.negf %30 : vector<2x128xf32>
    %32 = math.exp %31 : vector<2x128xf32>
    %cst_25 = arith.constant 1.000000e+00 : f32
    %33 = vector.broadcast %cst_25 : f32 to vector<2x128xf32>
    %34 = arith.addf %33, %32 : vector<2x128xf32>
    %35 = arith.divf %33, %34 : vector<2x128xf32>
    %36 = vector.extract_strided_slice %35 {offsets = [0, 0], sizes = [2, 64], strides = [1, 1]} : vector<2x128xf32> to vector<2x64xf32>
    %37 = vector.extract_strided_slice %35 {offsets = [0, 64], sizes = [2, 64], strides = [1, 1]} : vector<2x128xf32> to vector<2x64xf32>
    %38 = vector.extract_strided_slice %28 {offsets = [0, 128], sizes = [2, 64], strides = [1, 1]} : vector<2x192xf32> to vector<2x64xf32>
    %39 = arith.mulf %36, %38 : vector<2x64xf32>
    %40 = arith.addf %22, %39 : vector<2x64xf32>
    %41 = math.tanh %40 : vector<2x64xf32>
    %cst_26 = arith.constant 1.000000e+00 : f32
    %42 = vector.broadcast %cst_26 : f32 to vector<2x64xf32>
    %43 = arith.subf %42, %37 : vector<2x64xf32>
    %44 = arith.mulf %43, %41 : vector<2x64xf32>
    %45 = arith.mulf %37, %25 : vector<2x64xf32>
    %46 = arith.addf %44, %45 : vector<2x64xf32>
    %cst_27 = arith.constant dense<0.000000e+00> : vector<2x192xf32>
    %47 = tpu.matmul %46, %23, %cst_27 {dimension_numbers = #tpu.dot_dimension_numbers<[1], [0], [0], [1], [0, 0, 1, 1], [], []>} : vector<2x64xf32>, vector<64x192xf32>, vector<2x192xf32> -> vector<2x192xf32>
    %48 = vector.broadcast %24 : vector<1x192xf32> to vector<2x192xf32>
    %49 = arith.addf %47, %48 : vector<2x192xf32>
    %50 = vector.extract_strided_slice %49 {offsets = [0, 0], sizes = [2, 128], strides = [1, 1]} : vector<2x192xf32> to vector<2x128xf32>
    %51 = arith.addf %21, %50 : vector<2x128xf32>
    %52 = arith.negf %51 : vector<2x128xf32>
    %53 = math.exp %52 : vector<2x128xf32>
    %cst_28 = arith.constant 1.000000e+00 : f32
    %54 = vector.broadcast %cst_28 : f32 to vector<2x128xf32>
    %55 = arith.addf %54, %53 : vector<2x128xf32>
    %56 = arith.divf %54, %55 : vector<2x128xf32>
    %57 = vector.extract_strided_slice %56 {offsets = [0, 0], sizes = [2, 64], strides = [1, 1]} : vector<2x128xf32> to vector<2x64xf32>
    %58 = vector.extract_strided_slice %56 {offsets = [0, 64], sizes = [2, 64], strides = [1, 1]} : vector<2x128xf32> to vector<2x64xf32>
    %59 = vector.extract_strided_slice %49 {offsets = [0, 128], sizes = [2, 64], strides = [1, 1]} : vector<2x192xf32> to vector<2x64xf32>
    %60 = arith.mulf %57, %59 : vector<2x64xf32>
    %61 = arith.addf %22, %60 : vector<2x64xf32>
    %62 = math.tanh %61 : vector<2x64xf32>
    %cst_29 = arith.constant 1.000000e+00 : f32
    %63 = vector.broadcast %cst_29 : f32 to vector<2x64xf32>
    %64 = arith.subf %63, %58 : vector<2x64xf32>
    %65 = arith.mulf %64, %62 : vector<2x64xf32>
    %66 = arith.mulf %58, %46 : vector<2x64xf32>
    %67 = arith.addf %65, %66 : vector<2x64xf32>
    %cst_30 = arith.constant dense<0.000000e+00> : vector<2x192xf32>
    %68 = tpu.matmul %67, %23, %cst_30 {dimension_numbers = #tpu.dot_dimension_numbers<[1], [0], [0], [1], [0, 0, 1, 1], [], []>} : vector<2x64xf32>, vector<64x192xf32>, vector<2x192xf32> -> vector<2x192xf32>
    %69 = vector.broadcast %24 : vector<1x192xf32> to vector<2x192xf32>
    %70 = arith.addf %68, %69 : vector<2x192xf32>
    %71 = vector.extract_strided_slice %70 {offsets = [0, 0], sizes = [2, 128], strides = [1, 1]} : vector<2x192xf32> to vector<2x128xf32>
    %72 = arith.addf %21, %71 : vector<2x128xf32>
    %73 = arith.negf %72 : vector<2x128xf32>
    %74 = math.exp %73 : vector<2x128xf32>
    %cst_31 = arith.constant 1.000000e+00 : f32
    %75 = vector.broadcast %cst_31 : f32 to vector<2x128xf32>
    %76 = arith.addf %75, %74 : vector<2x128xf32>
    %77 = arith.divf %75, %76 : vector<2x128xf32>
    %78 = vector.extract_strided_slice %77 {offsets = [0, 0], sizes = [2, 64], strides = [1, 1]} : vector<2x128xf32> to vector<2x64xf32>
    %79 = vector.extract_strided_slice %77 {offsets = [0, 64], sizes = [2, 64], strides = [1, 1]} : vector<2x128xf32> to vector<2x64xf32>
    %80 = vector.extract_strided_slice %70 {offsets = [0, 128], sizes = [2, 64], strides = [1, 1]} : vector<2x192xf32> to vector<2x64xf32>
    %81 = arith.mulf %78, %80 : vector<2x64xf32>
    %82 = arith.addf %22, %81 : vector<2x64xf32>
    %83 = math.tanh %82 : vector<2x64xf32>
    %cst_32 = arith.constant 1.000000e+00 : f32
    %84 = vector.broadcast %cst_32 : f32 to vector<2x64xf32>
    %85 = arith.subf %84, %79 : vector<2x64xf32>
    %86 = arith.mulf %85, %83 : vector<2x64xf32>
    %87 = arith.mulf %79, %67 : vector<2x64xf32>
    %88 = arith.addf %86, %87 : vector<2x64xf32>
    %cst_33 = arith.constant dense<0.000000e+00> : vector<2x192xf32>
    %89 = tpu.matmul %88, %23, %cst_33 {dimension_numbers = #tpu.dot_dimension_numbers<[1], [0], [0], [1], [0, 0, 1, 1], [], []>} : vector<2x64xf32>, vector<64x192xf32>, vector<2x192xf32> -> vector<2x192xf32>
    %90 = vector.broadcast %24 : vector<1x192xf32> to vector<2x192xf32>
    %91 = arith.addf %89, %90 : vector<2x192xf32>
    %92 = vector.extract_strided_slice %91 {offsets = [0, 0], sizes = [2, 128], strides = [1, 1]} : vector<2x192xf32> to vector<2x128xf32>
    %93 = arith.addf %21, %92 : vector<2x128xf32>
    %94 = arith.negf %93 : vector<2x128xf32>
    %95 = math.exp %94 : vector<2x128xf32>
    %cst_34 = arith.constant 1.000000e+00 : f32
    %96 = vector.broadcast %cst_34 : f32 to vector<2x128xf32>
    %97 = arith.addf %96, %95 : vector<2x128xf32>
    %98 = arith.divf %96, %97 : vector<2x128xf32>
    %99 = vector.extract_strided_slice %98 {offsets = [0, 0], sizes = [2, 64], strides = [1, 1]} : vector<2x128xf32> to vector<2x64xf32>
    %100 = vector.extract_strided_slice %98 {offsets = [0, 64], sizes = [2, 64], strides = [1, 1]} : vector<2x128xf32> to vector<2x64xf32>
    %101 = vector.extract_strided_slice %91 {offsets = [0, 128], sizes = [2, 64], strides = [1, 1]} : vector<2x192xf32> to vector<2x64xf32>
    %102 = arith.mulf %99, %101 : vector<2x64xf32>
    %103 = arith.addf %22, %102 : vector<2x64xf32>
    %104 = math.tanh %103 : vector<2x64xf32>
    %cst_35 = arith.constant 1.000000e+00 : f32
    %105 = vector.broadcast %cst_35 : f32 to vector<2x64xf32>
    %106 = arith.subf %105, %100 : vector<2x64xf32>
    %107 = arith.mulf %106, %104 : vector<2x64xf32>
    %108 = arith.mulf %100, %88 : vector<2x64xf32>
    %109 = arith.addf %107, %108 : vector<2x64xf32>
    %cst_36 = arith.constant dense<0.000000e+00> : vector<2x192xf32>
    %110 = tpu.matmul %109, %23, %cst_36 {dimension_numbers = #tpu.dot_dimension_numbers<[1], [0], [0], [1], [0, 0, 1, 1], [], []>} : vector<2x64xf32>, vector<64x192xf32>, vector<2x192xf32> -> vector<2x192xf32>
    %111 = vector.broadcast %24 : vector<1x192xf32> to vector<2x192xf32>
    %112 = arith.addf %110, %111 : vector<2x192xf32>
    %113 = vector.extract_strided_slice %112 {offsets = [0, 0], sizes = [2, 128], strides = [1, 1]} : vector<2x192xf32> to vector<2x128xf32>
    %114 = arith.addf %21, %113 : vector<2x128xf32>
    %115 = arith.negf %114 : vector<2x128xf32>
    %116 = math.exp %115 : vector<2x128xf32>
    %cst_37 = arith.constant 1.000000e+00 : f32
    %117 = vector.broadcast %cst_37 : f32 to vector<2x128xf32>
    %118 = arith.addf %117, %116 : vector<2x128xf32>
    %119 = arith.divf %117, %118 : vector<2x128xf32>
    %120 = vector.extract_strided_slice %119 {offsets = [0, 0], sizes = [2, 64], strides = [1, 1]} : vector<2x128xf32> to vector<2x64xf32>
    %121 = vector.extract_strided_slice %119 {offsets = [0, 64], sizes = [2, 64], strides = [1, 1]} : vector<2x128xf32> to vector<2x64xf32>
    %122 = vector.extract_strided_slice %112 {offsets = [0, 128], sizes = [2, 64], strides = [1, 1]} : vector<2x192xf32> to vector<2x64xf32>
    %123 = arith.mulf %120, %122 : vector<2x64xf32>
    %124 = arith.addf %22, %123 : vector<2x64xf32>
    %125 = math.tanh %124 : vector<2x64xf32>
    %cst_38 = arith.constant 1.000000e+00 : f32
    %126 = vector.broadcast %cst_38 : f32 to vector<2x64xf32>
    %127 = arith.subf %126, %121 : vector<2x64xf32>
    %128 = arith.mulf %127, %125 : vector<2x64xf32>
    %129 = arith.mulf %121, %109 : vector<2x64xf32>
    %130 = arith.addf %128, %129 : vector<2x64xf32>
    %cst_39 = arith.constant dense<0.000000e+00> : vector<2x192xf32>
    %131 = tpu.matmul %130, %23, %cst_39 {dimension_numbers = #tpu.dot_dimension_numbers<[1], [0], [0], [1], [0, 0, 1, 1], [], []>} : vector<2x64xf32>, vector<64x192xf32>, vector<2x192xf32> -> vector<2x192xf32>
    %132 = vector.broadcast %24 : vector<1x192xf32> to vector<2x192xf32>
    %133 = arith.addf %131, %132 : vector<2x192xf32>
    %134 = vector.extract_strided_slice %133 {offsets = [0, 0], sizes = [2, 128], strides = [1, 1]} : vector<2x192xf32> to vector<2x128xf32>
    %135 = arith.addf %21, %134 : vector<2x128xf32>
    %136 = arith.negf %135 : vector<2x128xf32>
    %137 = math.exp %136 : vector<2x128xf32>
    %cst_40 = arith.constant 1.000000e+00 : f32
    %138 = vector.broadcast %cst_40 : f32 to vector<2x128xf32>
    %139 = arith.addf %138, %137 : vector<2x128xf32>
    %140 = arith.divf %138, %139 : vector<2x128xf32>
    %141 = vector.extract_strided_slice %140 {offsets = [0, 0], sizes = [2, 64], strides = [1, 1]} : vector<2x128xf32> to vector<2x64xf32>
    %142 = vector.extract_strided_slice %140 {offsets = [0, 64], sizes = [2, 64], strides = [1, 1]} : vector<2x128xf32> to vector<2x64xf32>
    %143 = vector.extract_strided_slice %133 {offsets = [0, 128], sizes = [2, 64], strides = [1, 1]} : vector<2x192xf32> to vector<2x64xf32>
    %144 = arith.mulf %141, %143 : vector<2x64xf32>
    %145 = arith.addf %22, %144 : vector<2x64xf32>
    %146 = math.tanh %145 : vector<2x64xf32>
    %cst_41 = arith.constant 1.000000e+00 : f32
    %147 = vector.broadcast %cst_41 : f32 to vector<2x64xf32>
    %148 = arith.subf %147, %142 : vector<2x64xf32>
    %149 = arith.mulf %148, %146 : vector<2x64xf32>
    %150 = arith.mulf %142, %130 : vector<2x64xf32>
    %151 = arith.addf %149, %150 : vector<2x64xf32>
    %cst_42 = arith.constant dense<0.000000e+00> : vector<2x192xf32>
    %152 = tpu.matmul %151, %23, %cst_42 {dimension_numbers = #tpu.dot_dimension_numbers<[1], [0], [0], [1], [0, 0, 1, 1], [], []>} : vector<2x64xf32>, vector<64x192xf32>, vector<2x192xf32> -> vector<2x192xf32>
    %153 = vector.broadcast %24 : vector<1x192xf32> to vector<2x192xf32>
    %154 = arith.addf %152, %153 : vector<2x192xf32>
    %155 = vector.extract_strided_slice %154 {offsets = [0, 0], sizes = [2, 128], strides = [1, 1]} : vector<2x192xf32> to vector<2x128xf32>
    %156 = arith.addf %21, %155 : vector<2x128xf32>
    %157 = arith.negf %156 : vector<2x128xf32>
    %158 = math.exp %157 : vector<2x128xf32>
    %cst_43 = arith.constant 1.000000e+00 : f32
    %159 = vector.broadcast %cst_43 : f32 to vector<2x128xf32>
    %160 = arith.addf %159, %158 : vector<2x128xf32>
    %161 = arith.divf %159, %160 : vector<2x128xf32>
    %162 = vector.extract_strided_slice %161 {offsets = [0, 0], sizes = [2, 64], strides = [1, 1]} : vector<2x128xf32> to vector<2x64xf32>
    %163 = vector.extract_strided_slice %161 {offsets = [0, 64], sizes = [2, 64], strides = [1, 1]} : vector<2x128xf32> to vector<2x64xf32>
    %164 = vector.extract_strided_slice %154 {offsets = [0, 128], sizes = [2, 64], strides = [1, 1]} : vector<2x192xf32> to vector<2x64xf32>
    %165 = arith.mulf %162, %164 : vector<2x64xf32>
    %166 = arith.addf %22, %165 : vector<2x64xf32>
    %167 = math.tanh %166 : vector<2x64xf32>
    %cst_44 = arith.constant 1.000000e+00 : f32
    %168 = vector.broadcast %cst_44 : f32 to vector<2x64xf32>
    %169 = arith.subf %168, %163 : vector<2x64xf32>
    %170 = arith.mulf %169, %167 : vector<2x64xf32>
    %171 = arith.mulf %163, %151 : vector<2x64xf32>
    %172 = arith.addf %170, %171 : vector<2x64xf32>
    %cst_45 = arith.constant dense<0.000000e+00> : vector<2x192xf32>
    %173 = tpu.matmul %172, %23, %cst_45 {dimension_numbers = #tpu.dot_dimension_numbers<[1], [0], [0], [1], [0, 0, 1, 1], [], []>} : vector<2x64xf32>, vector<64x192xf32>, vector<2x192xf32> -> vector<2x192xf32>
    %174 = vector.broadcast %24 : vector<1x192xf32> to vector<2x192xf32>
    %175 = arith.addf %173, %174 : vector<2x192xf32>
    %176 = vector.extract_strided_slice %175 {offsets = [0, 0], sizes = [2, 128], strides = [1, 1]} : vector<2x192xf32> to vector<2x128xf32>
    %177 = arith.addf %21, %176 : vector<2x128xf32>
    %178 = arith.negf %177 : vector<2x128xf32>
    %179 = math.exp %178 : vector<2x128xf32>
    %cst_46 = arith.constant 1.000000e+00 : f32
    %180 = vector.broadcast %cst_46 : f32 to vector<2x128xf32>
    %181 = arith.addf %180, %179 : vector<2x128xf32>
    %182 = arith.divf %180, %181 : vector<2x128xf32>
    %183 = vector.extract_strided_slice %182 {offsets = [0, 0], sizes = [2, 64], strides = [1, 1]} : vector<2x128xf32> to vector<2x64xf32>
    %184 = vector.extract_strided_slice %182 {offsets = [0, 64], sizes = [2, 64], strides = [1, 1]} : vector<2x128xf32> to vector<2x64xf32>
    %185 = vector.extract_strided_slice %175 {offsets = [0, 128], sizes = [2, 64], strides = [1, 1]} : vector<2x192xf32> to vector<2x64xf32>
    %186 = arith.mulf %183, %185 : vector<2x64xf32>
    %187 = arith.addf %22, %186 : vector<2x64xf32>
    %188 = math.tanh %187 : vector<2x64xf32>
    %cst_47 = arith.constant 1.000000e+00 : f32
    %189 = vector.broadcast %cst_47 : f32 to vector<2x64xf32>
    %190 = arith.subf %189, %184 : vector<2x64xf32>
    %191 = arith.mulf %190, %188 : vector<2x64xf32>
    %192 = arith.mulf %184, %172 : vector<2x64xf32>
    %193 = arith.addf %191, %192 : vector<2x64xf32>
    %194 = vector.extract_strided_slice %46 {offsets = [0, 0], sizes = [2, 32], strides = [1, 1]} : vector<2x64xf32> to vector<2x32xf32>
    %195 = vector.extract_strided_slice %193 {offsets = [0, 32], sizes = [2, 32], strides = [1, 1]} : vector<2x64xf32> to vector<2x32xf32>
    %196 = tpu.concatenate %194, %195 in 1 : vector<2x32xf32>, vector<2x32xf32> -> vector<2x64xf32>
    %197 = vector.extract_strided_slice %67 {offsets = [0, 0], sizes = [2, 32], strides = [1, 1]} : vector<2x64xf32> to vector<2x32xf32>
    %198 = vector.extract_strided_slice %172 {offsets = [0, 32], sizes = [2, 32], strides = [1, 1]} : vector<2x64xf32> to vector<2x32xf32>
    %199 = tpu.concatenate %197, %198 in 1 : vector<2x32xf32>, vector<2x32xf32> -> vector<2x64xf32>
    %200 = vector.extract_strided_slice %88 {offsets = [0, 0], sizes = [2, 32], strides = [1, 1]} : vector<2x64xf32> to vector<2x32xf32>
    %201 = vector.extract_strided_slice %151 {offsets = [0, 32], sizes = [2, 32], strides = [1, 1]} : vector<2x64xf32> to vector<2x32xf32>
    %202 = tpu.concatenate %200, %201 in 1 : vector<2x32xf32>, vector<2x32xf32> -> vector<2x64xf32>
    %203 = vector.extract_strided_slice %109 {offsets = [0, 0], sizes = [2, 32], strides = [1, 1]} : vector<2x64xf32> to vector<2x32xf32>
    %204 = vector.extract_strided_slice %130 {offsets = [0, 32], sizes = [2, 32], strides = [1, 1]} : vector<2x64xf32> to vector<2x32xf32>
    %205 = tpu.concatenate %203, %204 in 1 : vector<2x32xf32>, vector<2x32xf32> -> vector<2x64xf32>
    %206 = vector.extract_strided_slice %130 {offsets = [0, 0], sizes = [2, 32], strides = [1, 1]} : vector<2x64xf32> to vector<2x32xf32>
    %207 = vector.extract_strided_slice %109 {offsets = [0, 32], sizes = [2, 32], strides = [1, 1]} : vector<2x64xf32> to vector<2x32xf32>
    %208 = tpu.concatenate %206, %207 in 1 : vector<2x32xf32>, vector<2x32xf32> -> vector<2x64xf32>
    %209 = vector.extract_strided_slice %151 {offsets = [0, 0], sizes = [2, 32], strides = [1, 1]} : vector<2x64xf32> to vector<2x32xf32>
    %210 = vector.extract_strided_slice %88 {offsets = [0, 32], sizes = [2, 32], strides = [1, 1]} : vector<2x64xf32> to vector<2x32xf32>
    %211 = tpu.concatenate %209, %210 in 1 : vector<2x32xf32>, vector<2x32xf32> -> vector<2x64xf32>
    %212 = vector.extract_strided_slice %172 {offsets = [0, 0], sizes = [2, 32], strides = [1, 1]} : vector<2x64xf32> to vector<2x32xf32>
    %213 = vector.extract_strided_slice %67 {offsets = [0, 32], sizes = [2, 32], strides = [1, 1]} : vector<2x64xf32> to vector<2x32xf32>
    %214 = tpu.concatenate %212, %213 in 1 : vector<2x32xf32>, vector<2x32xf32> -> vector<2x64xf32>
    %215 = vector.extract_strided_slice %193 {offsets = [0, 0], sizes = [2, 32], strides = [1, 1]} : vector<2x64xf32> to vector<2x32xf32>
    %216 = vector.extract_strided_slice %46 {offsets = [0, 32], sizes = [2, 32], strides = [1, 1]} : vector<2x64xf32> to vector<2x32xf32>
    %217 = tpu.concatenate %215, %216 in 1 : vector<2x32xf32>, vector<2x32xf32> -> vector<2x64xf32>
    %218 = vector.shape_cast %196 : vector<2x64xf32> to vector<2x1x64xf32>
    %219 = vector.shape_cast %199 : vector<2x64xf32> to vector<2x1x64xf32>
    %220 = vector.shape_cast %202 : vector<2x64xf32> to vector<2x1x64xf32>
    %221 = vector.shape_cast %205 : vector<2x64xf32> to vector<2x1x64xf32>
    %222 = vector.shape_cast %208 : vector<2x64xf32> to vector<2x1x64xf32>
    %223 = vector.shape_cast %211 : vector<2x64xf32> to vector<2x1x64xf32>
    %224 = vector.shape_cast %214 : vector<2x64xf32> to vector<2x1x64xf32>
    %225 = vector.shape_cast %217 : vector<2x64xf32> to vector<2x1x64xf32>
    %226 = tpu.concatenate %218, %219, %220, %221, %222, %223, %224, %225 in 1 : vector<2x1x64xf32>, vector<2x1x64xf32>, vector<2x1x64xf32>, vector<2x1x64xf32>, vector<2x1x64xf32>, vector<2x1x64xf32>, vector<2x1x64xf32>, vector<2x1x64xf32> -> vector<2x8x64xf32>
    %227 = vector.shape_cast %226 : vector<2x8x64xf32> to vector<16x64xf32>
    %c0_48 = arith.constant 0 : index
    %c0_49 = arith.constant 0 : index
    %228 = vector.load %arg9[%c0_48, %c0_49] : memref<64x128xf32, #tpu.memory_space<vmem>>, vector<64x128xf32>
    %cst_50 = arith.constant dense<0.000000e+00> : vector<16x128xf32>
    %229 = tpu.matmul %227, %228, %cst_50 {dimension_numbers = #tpu.dot_dimension_numbers<[1], [0], [0], [1], [0, 0, 1, 1], [], []>} : vector<16x64xf32>, vector<64x128xf32>, vector<16x128xf32> -> vector<16x128xf32>
    %c0_51 = arith.constant 0 : index
    %c0_52 = arith.constant 0 : index
    %230 = vector.load %arg10[%c0_51, %c0_52] : memref<1x128xf32, #tpu.memory_space<vmem>>, vector<1x128xf32>
    %231 = vector.broadcast %230 : vector<1x128xf32> to vector<16x128xf32>
    %232 = arith.addf %229, %231 : vector<16x128xf32>
    %233 = vector.shape_cast %232 : vector<16x128xf32> to vector<2x8x128xf32>
    %c0_53 = arith.constant 0 : index
    %c0_54 = arith.constant 0 : index
    %c0_55 = arith.constant 0 : index
    %234 = vector.load %arg11[%c0_53, %c0_54, %c0_55] : memref<2x8x128xf32, #tpu.memory_space<vmem>>, vector<2x8x128xf32>
    tpu.vector_store %arg11[%c0_53, %c0_54, %c0_55], %233 {strides = array<i32>} : memref<2x8x128xf32, #tpu.memory_space<vmem>>, vector<2x8x128xf32>,
    return
  }
}

</mosaic_0001>

<bundles_post_ra>
// kernel: model_forward.1
= control target key start
LH: loop header
LB: loop body
LE: loop exit
PB: predicated region body
PF: predicated region fallthrough
CT: control target
= control target key end

     0   :  { %18 = vsyncpa [#allocation3], 0  ;;  %s2587_s0 = inlined_call_operand.hbm [shape: f32[2,32], index: 0, kind: input, shape index: {}]   ;;  %s2588_s1 = inlined_call_operand.hbm [shape: f32[32,32], index: 1, kind: input, shape index: {}]   ;;  %s2589_s2 = inlined_call_operand.vmem [shape: f32[1,32], index: 2, kind: input, shape index: {}]   ;;  %s2590_s3 = inlined_call_operand.hbm [shape: f32[32,32], index: 3, kind: input, shape index: {}]   ;;  %s2591_s4 = inlined_call_operand.vmem [shape: f32[1,32], index: 4, kind: input, shape index: {}]   ;;  %s2592_s5 = inlined_call_operand.hbm [shape: f32[32,192], index: 5, kind: input, shape index: {}]   ;;  %s2593_s6 = inlined_call_operand.vmem [shape: f32[1,192], index: 6, kind: input, shape index: {}]   ;;  %s2594_s7 = inlined_call_operand.hbm [shape: f32[64,192], index: 7, kind: input, shape index: {}]   ;;  %s2595_s8 = inlined_call_operand.vmem [shape: f32[1,192], index: 8, kind: input, shape index: {}]   ;;  %s2596_s9 = inlined_call_operand.hbm [shape: f32[64,128], index: 9, kind: input, shape index: {}]   ;;  %s2597_s10 = inlined_call_operand.vmem [shape: f32[1,128], index: 10, kind: input, shape index: {}]   ;;  %s2598_s11 = inlined_call_operand.hbm [shape: f32[2,8,128], index: 11, kind: output, shape index: {0}]   ;;  %s2599_s12 = inlined_call_operand.hbm [shape: f32[2,32], index: 12, kind: output, shape index: {1}]  }
   0x1   :  { %19 = vsyncpa [#allocation6], 0 }
   0x2   :  { %20 = vsyncpa [#allocation9], 0 }
   0x3   :  { %21 = vsyncpa [#allocation12], 0 }
   0x4   :  { %22 = vsyncpa [#allocation4], 0 }
   0x5   :  { %23 = vsyncpa [#allocation15], 0  ;;  %s2098_s21 = smov [#allocation5]   ;;  %s1910_s25 = scalar_lea.hbm %s2588_s1, 512 }
   0x6   :  { %s39_s22 = sshll.u32 %s2098_s21, 4  ;;  %p1911_p0 = scmp.ne.s32.totalorder %s2588_s1, %s1910_s25  ;;  %s40_s22 = int_to_ptr.vmem [resolvable:$true] %s39_s22 }
   0x7   :  { %p1914_p1 = scmp.lt.u32.totalorder %s1910_s25, %s2588_s1 }
   0x9   :  { %p1916_p2 = pnand %p1914_p1, %p1911_p0 }
   0xb   :  { %1919 = shalt.err (!%p1916_p2)
}
   0xc   :  { %s1920_s30 = scalar_lea.vmem %s40_s22, 512  ;;  %p1925_p4 = scmp.lt.s32.totalorder %s40_s22, %s40_s22 }
   0xd   :  { %p1921_p3 = scmp.ne.s32.totalorder %s40_s22, %s1920_s30  ;;  %p1926_p5 = scmp.lt.s32.totalorder %s1920_s30, %s1920_s30 }
   0xf   :  { %p1927_p6 = por %p1926_p5, %p1925_p4 }
  0x11   :  { %p1928_p7 = pnand %p1927_p6, %p1921_p3 }
  0x13   :  { %1931 = shalt.err (!%p1928_p7)
}
  0x14   :  { %s2099_s13 = smov 128   ;;  %s2100_s14 = smov 8  }
  0x15   :  { %45 = dma.hbm_to_vmem [thread:$0]  %s2588_s1, 512, %s40_s22, [#allocation6], %s2099_s13, %s2099_s13, %s2100_s14  }
  0x16   :  { %s2101_s17 = smov [#allocation8]   ;;  %s1932_s21 = scalar_lea.hbm %s2592_s5, 1024 }
  0x17   :  { %s67_s18 = sshll.u32 %s2101_s17, 4  ;;  %p1933_p8 = scmp.ne.s32.totalorder %s2592_s5, %s1932_s21  ;;  %s68_s18 = int_to_ptr.vmem [resolvable:$true] %s67_s18 }
  0x18   :  { %p1936_p9 = scmp.lt.u32.totalorder %s1932_s21, %s2592_s5 }
  0x1a   :  { %p1938_p10 = pnand %p1936_p9, %p1933_p8 }
  0x1c   :  { %1941 = shalt.err (!%p1938_p10)
}
  0x1d   :  { %s1942_s27 = scalar_lea.vmem %s68_s18, 1024  ;;  %p1947_p12 = scmp.lt.s32.totalorder %s68_s18, %s68_s18 }
  0x1e   :  { %p1943_p11 = scmp.ne.s32.totalorder %s68_s18, %s1942_s27  ;;  %p1948_p13 = scmp.lt.s32.totalorder %s1942_s27, %s1942_s27 }
  0x20   :  { %p1949_p0 = por %p1948_p13, %p1947_p12 }
  0x22   :  { %p1950_p1 = pnand %p1949_p0, %p1943_p11 }
  0x24   :  { %1953 = shalt.err (!%p1950_p1)
}
  0x25   :  { %s2102_s1 = smov 256   ;;  %s2103_s22 = smov 16  }
  0x26   :  { %73 = dma.hbm_to_vmem [thread:$0]  %s2592_s5, 1024, %s68_s18, [#allocation9], %s2102_s1, %s2102_s1, %s2103_s22  }
  0x27   :  { %s2104_s30 = smov [#allocation2]   ;;  %s2105_s16 = smov [#allocation7]  }
  0x28   :  { %s30_s15 = sshll.u32 %s2104_s30, 4  ;;  %s53_s17 = sshll.u32 %s2105_s16, 4  ;;  %s31_s15 = int_to_ptr.vmem [resolvable:$true] %s30_s15  ;;  %s2210_s17 = int_to_ptr.vmem [resolvable:$true] %s53_s17 }
  0x29   :  { %s1954_s21 = scalar_lea.hbm %s2587_s0, 32 }
  0x2a   :  { %p1955_p2 = scmp.ne.s32.totalorder %s2587_s0, %s1954_s21  ;;  %p1958_p3 = scmp.lt.u32.totalorder %s1954_s21, %s2587_s0 }
  0x2c   :  { %p1960_p4 = pnand %p1958_p3, %p1955_p2 }
  0x2e   :  { %1963 = shalt.err (!%p1960_p4)
}
  0x2f   :  { %s1964_s5 = scalar_lea.vmem %s31_s15, 32  ;;  %p1969_p6 = scmp.lt.s32.totalorder %s31_s15, %s31_s15 }
  0x30   :  { %p1965_p5 = scmp.ne.s32.totalorder %s31_s15, %s1964_s5  ;;  %p1970_p7 = scmp.lt.s32.totalorder %s1964_s5, %s1964_s5 }
  0x32   :  { %p1971_p8 = por %p1970_p7, %p1969_p6 }
  0x34   :  { %p1972_p9 = pnand %p1971_p8, %p1965_p5 }
  0x36   :  { %1975 = shalt.err (!%p1972_p9)
}
  0x37   :  { %33 = dma.hbm_to_vmem [thread:$0]  %s2587_s0, 32, %s31_s15, [#allocation3]  }
  0x38   :  { %s1976_s30 = scalar_lea.hbm %s2590_s3, 512 }
  0x39   :  { %p1977_p10 = scmp.ne.s32.totalorder %s2590_s3, %s1976_s30  ;;  %p1980_p11 = scmp.lt.u32.totalorder %s1976_s30, %s2590_s3 }
  0x3b   :  { %p1982_p12 = pnand %p1980_p11, %p1977_p10 }
  0x3d   :  { %1985 = shalt.err (!%p1982_p12)
}
  0x3e   :  { %s1986_s23 = scalar_lea.vmem %s2210_s17, 512  ;;  %p1991_p0 = scmp.lt.s32.totalorder %s2210_s17, %s2210_s17 }
  0x3f   :  { %p1987_p13 = scmp.ne.s32.totalorder %s2210_s17, %s1986_s23  ;;  %p1992_p1 = scmp.lt.s32.totalorder %s1986_s23, %s1986_s23 }
  0x41   :  { %p1993_p2 = por %p1992_p1, %p1991_p0 }
  0x43   :  { %p1994_p3 = pnand %p1993_p2, %p1987_p13 }
  0x45   :  { %1997 = shalt.err (!%p1994_p3)
}
  0x46   :  { %59 = dma.hbm_to_vmem [thread:$0]  %s2590_s3, 512, %s2210_s17, [#allocation6], %s2099_s13, %s2099_s13, %s2100_s14  }
  0x47   :  { %s2106_s24 = smov [#allocation10]   ;;  %s2107_s26 = smov [#allocation11]  }
  0x48   :  { %s81_s25 = sshll.u32 %s2106_s24, 4  ;;  %s95_s5 = sshll.u32 %s2107_s26, 4  ;;  %s82_s25 = int_to_ptr.vmem [resolvable:$true] %s81_s25  ;;  %s2244_s5 = int_to_ptr.vmem [resolvable:$true] %s95_s5 }
  0x49   :  { %s1998_s28 = scalar_lea.hbm %s2594_s7, 2048 }
  0x4a   :  { %p1999_p4 = scmp.ne.s32.totalorder %s2594_s7, %s1998_s28  ;;  %p2002_p5 = scmp.lt.u32.totalorder %s1998_s28, %s2594_s7 }
  0x4c   :  { %p2004_p6 = pnand %p2002_p5, %p1999_p4 }
  0x4e   :  { %2007 = shalt.err (!%p2004_p6)
}
  0x4f   :  { %s2008_s3 = scalar_lea.vmem %s82_s25, 2048  ;;  %p2013_p8 = scmp.lt.s32.totalorder %s82_s25, %s82_s25 }
  0x50   :  { %p2009_p7 = scmp.ne.s32.totalorder %s82_s25, %s2008_s3  ;;  %p2014_p9 = scmp.lt.s32.totalorder %s2008_s3, %s2008_s3 }
  0x52   :  { %p2015_p10 = por %p2014_p9, %p2013_p8 }
  0x54   :  { %p2016_p11 = pnand %p2015_p10, %p2009_p7 }
  0x56   :  { %2019 = shalt.err (!%p2016_p11)
}
  0x57   :  { %87 = dma.hbm_to_vmem [thread:$0]  %s2594_s7, 2048, %s82_s25, [#allocation9], %s2102_s1, %s2102_s1, %s2103_s22  }
  0x58   :  { %s2020_s0 = scalar_lea.hbm %s2596_s9, 1024 }
  0x59   :  { %p2021_p12 = scmp.ne.s32.totalorder %s2596_s9, %s2020_s0  ;;  %p2024_p13 = scmp.lt.u32.totalorder %s2020_s0, %s2596_s9 }
  0x5b   :  { %p2026_p0 = pnand %p2024_p13, %p2021_p12 }
  0x5d   :  { %2029 = shalt.err (!%p2026_p0)
}
  0x5e   :  { %s2030_s27 = scalar_lea.vmem %s2244_s5, 1024  ;;  %p2035_p2 = scmp.lt.s32.totalorder %s2244_s5, %s2244_s5 }
  0x5f   :  { %p2031_p1 = scmp.ne.s32.totalorder %s2244_s5, %s2030_s27  ;;  %p2036_p3 = scmp.lt.s32.totalorder %s2030_s27, %s2030_s27 }
  0x61   :  { %p2037_p4 = por %p2036_p3, %p2035_p2 }
  0x63   :  { %p2038_p5 = pnand %p2037_p4, %p2031_p1 }
  0x65   :  { %2041 = shalt.err (!%p2038_p5)
}
  0x66   :  { %101 = dma.hbm_to_vmem [thread:$0]  %s2596_s9, 1024, %s2244_s5, [#allocation12], %s2099_s13, %s2099_s13, %s2100_s14  }
  0x67   :  { %2086 = dma.done.wait [#allocation3], 32  }
  0x68   :  { %2087 = vsyncadd [#allocation3], 4294967264 }
  0x69   :  { %2088 = dma.done.wait [#allocation6], 1024  }
  0x6a   :  { %2089 = vsyncadd [#allocation6], 4294966272 }
  0x6b   :  { %2090 = dma.done.wait [#allocation9], 3072  }
  0x6c   :  { %2091 = vsyncadd [#allocation9], 4294964224 }
  0x6d   :  { %2092 = dma.done.wait [#allocation12], 1024  }
  0x6e   :  { %2093 = vsyncadd [#allocation12], 4294966272  ;;  %v2108_v0 = vmov 0.0|0.0   ;;  %vm2109_vm0 = vmmov 0   ;;  %v2110_v1 = vmov 0.0   ;;  %v123_v2 = vld [vmem:[#allocation5] sm:$0xff]  ;;  %v306_v63 = vlaneseq }
  0x6f   :  { %1681 = vmatprep.subr.bf16.mxu0 %v2108_v0  ;;  %1648 = vmatprep.mubr.msk.f32.mxu0 %vm2109_vm0, %v2110_v1  ;;  %v124_v3 = vld [vmem:[#allocation5 + $0x8] sm:$0xff]  ;;  %v125_v4 = vld [vmem:[#allocation5 + $0x10] sm:$0xff]  ;;  %v126_v6 = vld [vmem:[#allocation5 + $0x18] sm:$0xff]  ;;  %vm134_vm1 = vcmask 261120   ;;  %vm294_vm2 = vcmask 254976   ;;  %vm418_vm3 = vcmask 523264  }
  0x70   :  { %1687 = vmatprep.subr.bf16.mxu1 %v2108_v0  ;;  %1659 = vmatprep.mubr.msk.f32.mxu1 %vm2109_vm0, %v2110_v1  ;;  %v1682_v5 = vpack.c.bf16 %v124_v3, %v123_v2  ;;  %v209_v7 = vld [vmem:[#allocation7] sm:$0xff]  ;;  %v210_v8 = vld [vmem:[#allocation7 + $0x8] sm:$0xff]  ;;  %v1685_v9 = vpack.c.bf16 %v126_v6, %v125_v4  ;;  %v122_v11 = vld [vmem:[#allocation2] sm:$0x3]  ;;  %vm1444_vm4 = vcmask 1040384   ;;  %vm1447_vm5 = vcmask 1041408  }
  0x71   :  { %v1688_v10 = vpack.c.bf16 %v210_v8, %v209_v7  ;;  %v211_v12 = vld [vmem:[#allocation7 + $0x10] sm:$0xff]  ;;  %v212_v13 = vld [vmem:[#allocation7 + $0x18] sm:$0xff]  ;;  %v391_v15 = vld [vmem:[#allocation10 + $0x8] sm:$0xff]  ;;  %vm1450_vm6 = vcmask 1042432   ;;  %vm1453_vm7 = vcmask 1043456   ;;  %vm1456_vm8 = vcmask 1044480  }
  0x72   :  { %1683 = vmatpush3.bf16.msra.mxu0 %v1682_v5  ;;  %v1691_v14 = vpack.c.bf16 %v212_v13, %v211_v12  ;;  %v393_v16 = vld [vmem:[#allocation10 + $0x18] sm:$0xff]  ;;  %v297_v18 = vld [vmem:[#allocation8 + $0x8] sm:$0xff]  ;;  %v296_v21 = vld [vmem:[#allocation8] sm:$0xff]  ;;  %vm1459_vm9 = vcmask 1045504   ;;  %vm1462_vm10 = vcmask 1046528  }
  0x73   :  { %1684 = vmatprep.subr.bf16.mxu0 %v2108_v0  ;;  %1689 = vmatpush3.bf16.msra.mxu1 %v1688_v10  ;;  %v2285_v17 = vpack.c.bf16 %v393_v16, %v391_v15  ;;  %v299_v19 = vld [vmem:[#allocation8 + $0x18] sm:$0xff]  ;;  %v298_v22 = vld [vmem:[#allocation8 + $0x10] sm:$0xff]  ;;  %v390_v25 = vld [vmem:[#allocation10] sm:$0xff] }
  0x74   :  { %1690 = vmatprep.subr.bf16.mxu1 %v2108_v0  ;;  %v1693_v20 = vpack.c.bf16 %v299_v19, %v297_v18  ;;  %v1695_v23 = vpack.c.bf16 %v298_v22, %v296_v21  ;;  %v1597_v24 = vld [vmem:[%s2589_s2] ss:$0 sm:$0xff]  ;;  %v392_v26 = vld [vmem:[#allocation10 + $0x10] sm:$0xff]  ;;  %v395_v28 = vld [vmem:[#allocation10 + $0x28] sm:$0xff]  ;;  %v2339_v0 = vshrl.u32 %v306_v63, 7 }
  0x75   :  { %v397_v29 = vld [vmem:[#allocation10 + $0x38] sm:$0xff]  ;;  %v2291_v32 = vpack.c.bf16 %v392_v26, %v390_v25  ;;  %v394_v35 = vld [vmem:[#allocation10 + $0x20] sm:$0xff]  ;;  %v396_v36 = vld [vmem:[#allocation10 + $0x30] sm:$0xff] }
  0x76   :  { %1686 = vmatpush3.bf16.msra.mxu0 %v1685_v9  ;;  %v2293_v34 = vpack.c.bf16 %v397_v29, %v395_v28  ;;  %v399_v37 = vld [vmem:[#allocation10 + $0x48] sm:$0xff]  ;;  %v401_v38 = vld [vmem:[#allocation10 + $0x58] sm:$0xff]  ;;  %v2297_v39 = vpack.c.bf16 %v396_v36, %v394_v35  ;;  %v398_v41 = vld [vmem:[#allocation10 + $0x40] sm:$0xff]  ;;  %v2342_v2 = vsub.s32 0, %v2339_v0  ;;  %v312_v15 = vsub.s32 1, %v2339_v0 }
  0x77   :  { %1692 = vmatpush3.bf16.msra.mxu1 %v1691_v14  ;;  %1694 = vmatprep.subr.bf16.mxu0 %v1693_v20  ;;  %v2301_v40 = vpack.c.bf16 %v401_v38, %v399_v37  ;;  %v400_v42 = vld [vmem:[#allocation10 + $0x50] sm:$0xff]  ;;  %v403_v44 = vld [vmem:[#allocation10 + $0x68] sm:$0xff]  ;;  %v405_v45 = vld [vmem:[#allocation10 + $0x78] sm:$0xff] }
  0x78   :  { %1702 = vmatprep.subr.bf16.mxu1 %v2285_v17  ;;  %v2304_v43 = vpack.c.bf16 %v400_v42, %v398_v41  ;;  %v2308_v46 = vpack.c.bf16 %v405_v45, %v403_v44  ;;  %v301_v47 = vld [vmem:[#allocation8 + $0x28] sm:$0xff]  ;;  %v303_v48 = vld [vmem:[#allocation8 + $0x38] sm:$0xff]  ;;  %v402_v49 = vld [vmem:[#allocation10 + $0x60] sm:$0xff] }
  0x79   :  { %1649 = vmatmul.mubr.msk.f32.vlgmr.msra.gmra.mrb[0].mxu0 %vm134_vm1, %v122_v11  ;;  %v1697_v50 = vpack.c.bf16 %v303_v48, %v301_v47  ;;  %v404_v51 = vld [vmem:[#allocation10 + $0x70] sm:$0xff]  ;;  %v300_v52 = vld [vmem:[#allocation8 + $0x20] sm:$0xff]  ;;  %v1599_v56 = vld [vmem:[%s2591_s4] ss:$0 sm:$0xff] }
  0x7a   :  { %383 = vmatprep.mubr.f32.mxu0 %v2110_v1  ;;  %1696 = vmatpush1.bf16.msra.mxu0 %v1695_v23  ;;  %v302_v53 = vld [vmem:[#allocation8 + $0x30] sm:$0xff]  ;;  %v2311_v54 = vpack.c.bf16 %v404_v51, %v402_v49  ;;  %v406_v3 = vld [vmem:[%s2595_s8] sm:$0x3]  ;;  %s2113_s8 = smov [#allocation14]  }
  0x7b   :  { %v1699_v55 = vpack.c.bf16 %v302_v53, %v300_v52  ;;  %1698 = vmatprep.subr.bf16.mxu0 %v1697_v50  ;;  %v304_v4 = vld [vmem:[%s2593_s6] sm:$0x3]  ;;  %v2351_v5 = vrot.slane %v406_v3, %v2342_v2  ;;  %v2359_v16 = vrot.slane %v406_v3, %v312_v15  ;;  %s2111_s6 = smov 64   ;;  %s1581_s30 = sshll.u32 %s2113_s8, 4  ;;  %s1582_s30 = int_to_ptr.vmem [resolvable:$true] %s1581_s30 }
  0x7c   :  { %v309_v6 = vrot.slane %v304_v4, %v2342_v2  ;;  %v313_v18 = vrot.slane %v304_v4, %v312_v15  ;;  %s2042_s16 = scalar_lea.vmem %s1582_s30, 32  ;;  %p2047_p7 = scmp.lt.s32.totalorder %s1582_s30, %s1582_s30 }
  0x7d   :  { %p2043_p6 = scmp.ne.s32.totalorder %s1582_s30, %s2042_s16  ;;  %p2048_p8 = scmp.lt.s32.totalorder %s2042_s16, %s2042_s16 }
  0x7e   :  { %1700 = vmatpush1.bf16.msra.mxu0 %v1699_v55 }
  0x7f   :  { %1718 = vmatprep.subr.bf16.mxu0 %v2285_v17  ;;  %p2049_p9 = por %p2048_p8, %p2047_p7 }
  0x81   :  { %p2050_p10 = pnand %p2049_p9, %p2043_p6 }
 0x14c   :  { %v204_v27 = vpop.f32.mrb[0].mxu0 }
 0x14d   :  { %v205_v30 = vadd.f32 %v1597_v24, %v204_v27  ;;  %v1650_v31 = vpop.f32.mrb[1].mxu0 }
 0x14f   :  { %v208_v33 = vmax.f32 %v205_v30, 0.0 }
 0x151   :  { %1660 = vmatmul.mubr.msk.f32.vlgmr.msra.gmra.mrb[0].mxu1 %vm134_vm1, %v208_v33 }
 0x152   :  { %1704 = vmatpush1.bf16.msra.mxu1 %v2291_v32  ;;  %486 = vmatprep.mubr.f32.mxu1 %v2110_v1 }
 0x153   :  { %1706 = vmatprep.subr.bf16.mxu1 %v2293_v34 }
 0x156   :  { %1708 = vmatpush1.bf16.msra.mxu1 %v2297_v39 }
 0x157   :  { %1710 = vmatprep.subr.bf16.mxu1 %v2301_v40 }
 0x15a   :  { %1712 = vmatpush1.bf16.msra.mxu1 %v2304_v43 }
 0x15b   :  { %1714 = vmatprep.subr.bf16.mxu1 %v2308_v46 }
 0x15e   :  { %1716 = vmatpush1.bf16.msra.mxu1 %v2311_v54 }
 0x15f   :  { %1734 = vmatprep.subr.bf16.mxu1 %v2285_v17 }
 0x161   :  { %487 = vmatmul.mubr.f32.vlgmr.msra.gmra.mrb[2].mxu1 %v2110_v1 }
 0x162   :  { %1736 = vmatpush1.bf16.msra.mxu1 %v2291_v32  ;;  %674 = vmatprep.mubr.f32.mxu1 %v2110_v1 }
 0x163   :  { %1738 = vmatprep.subr.bf16.mxu1 %v2293_v34 }
 0x166   :  { %1740 = vmatpush1.bf16.msra.mxu1 %v2297_v39 }
 0x167   :  { %1742 = vmatprep.subr.bf16.mxu1 %v2301_v40 }
 0x16a   :  { %1744 = vmatpush1.bf16.msra.mxu1 %v2304_v43 }
 0x16b   :  { %1746 = vmatprep.subr.bf16.mxu1 %v2308_v46 }
 0x16e   :  { %1748 = vmatpush1.bf16.msra.mxu1 %v2311_v54 }
 0x16f   :  { %1766 = vmatprep.subr.bf16.mxu1 %v2285_v17 }
 0x224   :  { %v289_v57 = vpop.f32.mrb[0].mxu1 }
 0x225   :  { %v290_v58 = vadd.f32 %v1599_v56, %v289_v57  ;;  %v1661_v59 = vpop.f32.mrb[1].mxu1 }
 0x227   :  { %v293_v60 = vmax.f32 %v290_v58, 0.0 }
 0x229   :  { %1601 = vmatmul.mubr.msk.f32.vlgmr.msra.gmra.mrb[2].mxu0 %vm134_vm1, %v293_v60  ;;  %295 = vst.msk [vmem:[#allocation14] sm:$0x3] %vm294_vm2, %v293_v60 }
 0x22a   :  { %1720 = vmatpush1.bf16.msra.mxu0 %v2291_v32  ;;  %580 = vmatprep.mubr.f32.mxu0 %v2110_v1 }
 0x22b   :  { %1722 = vmatprep.subr.bf16.mxu0 %v2293_v34 }
 0x22e   :  { %1724 = vmatpush1.bf16.msra.mxu0 %v2297_v39 }
 0x22f   :  { %1726 = vmatprep.subr.bf16.mxu0 %v2301_v40 }
 0x232   :  { %1728 = vmatpush1.bf16.msra.mxu0 %v2304_v43 }
 0x233   :  { %1730 = vmatprep.subr.bf16.mxu0 %v2308_v46 }
 0x234   :  { %v488_v61 = vpop.f32.mrb[2].mxu1 }
 0x235   :  { %v490_v62 = vpop.f32.mrb[3].mxu1  ;;  %v489_v7 = vadd.f32 %v488_v61, %v2351_v5 }
 0x236   :  { %1732 = vmatpush1.bf16.msra.mxu0 %v2311_v54  ;;  %v491_v19 = vadd.f32 %v490_v62, %v2359_v16 }
 0x237   :  { %1750 = vmatprep.subr.bf16.mxu0 %v2285_v17 }
 0x2fc   :  { %v385_v8 = vpop.f32.mrb[2].mxu0 }
 0x2fd   :  { %v2355_v9 = vadd.f32 %v385_v8, %v309_v6  ;;  %v387_v10 = vpop.f32.mrb[3].mxu0 }
 0x2fe   :  { %v2362_v22 = vadd.f32 %v387_v10, %v313_v18 }
 0x2ff   :  { %v493_v11 = vadd.f32 %v489_v7, %v2355_v9 }
 0x301   :  { %v1602_v12 = vmul.f32 -1.442695, %v493_v11 }
 0x303   :  { %1862 = vpow2.f32 %v1602_v12 }
 0x30d   :  { %v1863_v13 = vpop.eup %1862 }
 0x30e   :  { %v497_v14 = vadd.f32 1.0, %v1863_v13 }
 0x310   :  { %1864 = vrcp.f32 %v497_v14 }
 0x31a   :  { %v1865_v20 = vpop.eup %1864 }
 0x31b   :  { %v500_v21 = vmul.f32 %v1865_v20, %v491_v19  ;;  %v503_v25 = vsub.f32 1.0, %v1865_v20  ;;  %v509_v27 = vmul.f32 0.0, %v1865_v20 }
 0x31d   :  { %v501_v23 = vadd.f32 %v500_v21, %v2362_v22 }
 0x31f   :  { %1866 = vtanh.f32 %v501_v23 }
 0x329   :  { %v1867_v24 = vpop.eup %1866 }
 0x32a   :  { %505 = vrot.lane.b32.xlu0 %v1867_v24, %s2111_s6 }
 0x39c   :  { %v506_v26 = vpop.permute.xlu0 %505 }
 0x39d   :  { %v508_v28 = vmul.f32 %v506_v26, %v503_v25 }
 0x39f   :  { %v510_v29 = vadd.f32 %v509_v27, %v508_v28 }
 0x3a1   :  { %512 = vrot.lane.b32.xlu0 %v510_v29, %s2111_s6 }
 0x413   :  { %v2367_v30 = vpop.permute.xlu0 %512 }
 0x414   :  { %1603 = vmatmul.mubr.msk.f32.vlgmr.msra.gmra.mrb[4].mxu0 %vm418_vm3, %v2367_v30 }
 0x415   :  { %1752 = vmatpush1.bf16.msra.mxu0 %v2291_v32  ;;  %768 = vmatprep.mubr.f32.mxu0 %v2110_v1 }
 0x416   :  { %1754 = vmatprep.subr.bf16.mxu0 %v2293_v34 }
 0x419   :  { %1756 = vmatpush1.bf16.msra.mxu0 %v2297_v39 }
 0x41a   :  { %1758 = vmatprep.subr.bf16.mxu0 %v2301_v40 }
 0x41d   :  { %1760 = vmatpush1.bf16.msra.mxu0 %v2304_v43 }
 0x41e   :  { %1762 = vmatprep.subr.bf16.mxu0 %v2308_v46 }
 0x421   :  { %1764 = vmatpush1.bf16.msra.mxu0 %v2311_v54 }
 0x422   :  { %1782 = vmatprep.subr.bf16.mxu0 %v2285_v17 }
 0x4e7   :  { %v582_v31 = vpop.f32.mrb[4].mxu0 }
 0x4e8   :  { %v583_v33 = vadd.f32 %v582_v31, %v2351_v5  ;;  %v584_v35 = vpop.f32.mrb[5].mxu0 }
 0x4e9   :  { %v585_v42 = vadd.f32 %v584_v35, %v2359_v16 }
 0x4ea   :  { %v587_v36 = vadd.f32 %v583_v33, %v2355_v9 }
 0x4ec   :  { %v1604_v37 = vmul.f32 -1.442695, %v587_v36 }
 0x4ee   :  { %1868 = vpow2.f32 %v1604_v37 }
 0x4f8   :  { %v1869_v38 = vpop.eup %1868 }
 0x4f9   :  { %v591_v41 = vadd.f32 1.0, %v1869_v38 }
 0x4fb   :  { %1870 = vrcp.f32 %v591_v41 }
 0x505   :  { %v1871_v44 = vpop.eup %1870 }
 0x506   :  { %v594_v45 = vmul.f32 %v1871_v44, %v585_v42  ;;  %v597_v49 = vsub.f32 1.0, %v1871_v44  ;;  %v603_v51 = vmul.f32 %v1871_v44, %v510_v29 }
 0x508   :  { %v595_v47 = vadd.f32 %v594_v45, %v2362_v22 }
 0x50a   :  { %1872 = vtanh.f32 %v595_v47 }
 0x514   :  { %v1873_v48 = vpop.eup %1872 }
 0x515   :  { %599 = vrot.lane.b32.xlu1 %v1873_v48, %s2111_s6 }
 0x587   :  { %v600_v50 = vpop.permute.xlu1 %599 }
 0x588   :  { %v602_v52 = vmul.f32 %v600_v50, %v597_v49 }
 0x58a   :  { %v604_v53 = vadd.f32 %v603_v51, %v602_v52 }
 0x58c   :  { %606 = vrot.lane.b32.xlu1 %v604_v53, %s2111_s6 }
 0x5fe   :  { %v2386_v55 = vpop.permute.xlu1 %606 }
 0x5ff   :  { %1605 = vmatmul.mubr.msk.f32.vlgmr.msra.gmra.mrb[4].mxu1 %vm418_vm3, %v2386_v55 }
 0x600   :  { %1768 = vmatpush1.bf16.msra.mxu1 %v2291_v32  ;;  %862 = vmatprep.mubr.f32.mxu1 %v2110_v1 }
 0x601   :  { %1770 = vmatprep.subr.bf16.mxu1 %v2293_v34 }
 0x604   :  { %1772 = vmatpush1.bf16.msra.mxu1 %v2297_v39 }
 0x605   :  { %1774 = vmatprep.subr.bf16.mxu1 %v2301_v40 }
 0x608   :  { %1776 = vmatpush1.bf16.msra.mxu1 %v2304_v43 }
 0x609   :  { %1778 = vmatprep.subr.bf16.mxu1 %v2308_v46 }
 0x60c   :  { %1780 = vmatpush1.bf16.msra.mxu1 %v2311_v54 }
 0x60d   :  { %1798 = vmatprep.subr.bf16.mxu1 %v2285_v17 }
 0x6d2   :  { %v676_v56 = vpop.f32.mrb[4].mxu1 }
 0x6d3   :  { %v677_v57 = vadd.f32 %v676_v56, %v2351_v5  ;;  %v678_v58 = vpop.f32.mrb[5].mxu1 }
 0x6d4   :  { %v679_v63 = vadd.f32 %v678_v58, %v2359_v16 }
 0x6d5   :  { %v681_v59 = vadd.f32 %v677_v57, %v2355_v9 }
 0x6d7   :  { %v1606_v60 = vmul.f32 -1.442695, %v681_v59 }
 0x6d9   :  { %1874 = vpow2.f32 %v1606_v60 }
 0x6e3   :  { %v1875_v61 = vpop.eup %1874 }
 0x6e4   :  { %v685_v62 = vadd.f32 1.0, %v1875_v61 }
 0x6e6   :  { %1876 = vrcp.f32 %v685_v62 }
 0x6f0   :  { %v1877_v3 = vpop.eup %1876 }
 0x6f1   :  { %v688_v4 = vmul.f32 %v1877_v3, %v679_v63  ;;  %v691_v8 = vsub.f32 1.0, %v1877_v3  ;;  %v697_v11 = vmul.f32 %v1877_v3, %v604_v53 }
 0x6f3   :  { %v689_v6 = vadd.f32 %v688_v4, %v2362_v22 }
 0x6f5   :  { %1878 = vtanh.f32 %v689_v6 }
 0x6ff   :  { %v1879_v7 = vpop.eup %1878 }
 0x700   :  { %693 = vrot.lane.b32.xlu0 %v1879_v7, %s2111_s6 }
 0x772   :  { %v694_v10 = vpop.permute.xlu0 %693 }
 0x773   :  { %v696_v12 = vmul.f32 %v694_v10, %v691_v8 }
 0x775   :  { %v698_v13 = vadd.f32 %v697_v11, %v696_v12 }
 0x777   :  { %700 = vrot.lane.b32.xlu1 %v698_v13, %s2111_s6 }
 0x7e9   :  { %v2405_v14 = vpop.permute.xlu1 %700 }
 0x7ea   :  { %1607 = vmatmul.mubr.msk.f32.vlgmr.msra.gmra.mrb[6].mxu0 %vm418_vm3, %v2405_v14 }
 0x7eb   :  { %1784 = vmatpush1.bf16.msra.mxu0 %v2291_v32  ;;  %956 = vmatprep.mubr.f32.mxu0 %v2110_v1 }
 0x7ec   :  { %1786 = vmatprep.subr.bf16.mxu0 %v2293_v34 }
 0x7ef   :  { %1788 = vmatpush1.bf16.msra.mxu0 %v2297_v39 }
 0x7f0   :  { %1790 = vmatprep.subr.bf16.mxu0 %v2301_v40 }
 0x7f3   :  { %1792 = vmatpush1.bf16.msra.mxu0 %v2304_v43 }
 0x7f4   :  { %1794 = vmatprep.subr.bf16.mxu0 %v2308_v46 }
 0x7f7   :  { %1796 = vmatpush1.bf16.msra.mxu0 %v2311_v54 }
 0x7f8   :  { %1814 = vmatprep.subr.bf16.mxu0 %v2285_v17 }
 0x8bd   :  { %v770_v15 = vpop.f32.mrb[6].mxu0 }
 0x8be   :  { %v771_v18 = vadd.f32 %v770_v15, %v2351_v5  ;;  %v772_v19 = vpop.f32.mrb[7].mxu0 }
 0x8bf   :  { %v773_v25 = vadd.f32 %v772_v19, %v2359_v16 }
 0x8c0   :  { %v775_v20 = vadd.f32 %v771_v18, %v2355_v9 }
 0x8c2   :  { %v1608_v21 = vmul.f32 -1.442695, %v775_v20 }
 0x8c4   :  { %1880 = vpow2.f32 %v1608_v21 }
 0x8ce   :  { %v1881_v23 = vpop.eup %1880 }
 0x8cf   :  { %v779_v24 = vadd.f32 1.0, %v1881_v23 }
 0x8d1   :  { %1882 = vrcp.f32 %v779_v24 }
 0x8db   :  { %v1883_v26 = vpop.eup %1882 }
 0x8dc   :  { %v782_v27 = vmul.f32 %v1883_v26, %v773_v25  ;;  %v785_v17 = vsub.f32 1.0, %v1883_v26  ;;  %v791_v33 = vmul.f32 %v1883_v26, %v698_v13 }
 0x8de   :  { %v783_v28 = vadd.f32 %v782_v27, %v2362_v22 }
 0x8e0   :  { %1884 = vtanh.f32 %v783_v28 }
 0x8ea   :  { %v1885_v29 = vpop.eup %1884 }
 0x8eb   :  { %787 = vrot.lane.b32.xlu0 %v1885_v29, %s2111_s6 }
 0x95d   :  { %v788_v31 = vpop.permute.xlu0 %787 }
 0x95e   :  { %v790_v35 = vmul.f32 %v788_v31, %v785_v17 }
 0x960   :  { %v792_v36 = vadd.f32 %v791_v33, %v790_v35 }
 0x962   :  { %794 = vrot.lane.b32.xlu1 %v792_v36, %s2111_s6 }
 0x9d4   :  { %v2424_v37 = vpop.permute.xlu1 %794 }
 0x9d5   :  { %1609 = vmatmul.mubr.msk.f32.vlgmr.msra.gmra.mrb[6].mxu1 %vm418_vm3, %v2424_v37 }
 0x9d6   :  { %1800 = vmatpush1.bf16.msra.mxu1 %v2291_v32  ;;  %1050 = vmatprep.mubr.f32.mxu1 %v2110_v1 }
 0x9d7   :  { %1802 = vmatprep.subr.bf16.mxu1 %v2293_v34 }
 0x9da   :  { %1804 = vmatpush1.bf16.msra.mxu1 %v2297_v39 }
 0x9db   :  { %1806 = vmatprep.subr.bf16.mxu1 %v2301_v40 }
 0x9de   :  { %1808 = vmatpush1.bf16.msra.mxu1 %v2304_v43 }
 0x9df   :  { %1810 = vmatprep.subr.bf16.mxu1 %v2308_v46 }
 0x9e2   :  { %1812 = vmatpush1.bf16.msra.mxu1 %v2311_v54 }
 0xaa8   :  { %v864_v38 = vpop.f32.mrb[6].mxu1 }
 0xaa9   :  { %v865_v41 = vadd.f32 %v864_v38, %v2351_v5  ;;  %v866_v42 = vpop.f32.mrb[7].mxu1 }
 0xaaa   :  { %v867_v49 = vadd.f32 %v866_v42, %v2359_v16 }
 0xaab   :  { %v869_v44 = vadd.f32 %v865_v41, %v2355_v9 }
 0xaad   :  { %v1610_v45 = vmul.f32 -1.442695, %v869_v44 }
 0xaaf   :  { %1886 = vpow2.f32 %v1610_v45 }
 0xab9   :  { %v1887_v47 = vpop.eup %1886 }
 0xaba   :  { %v873_v48 = vadd.f32 1.0, %v1887_v47 }
 0xabc   :  { %1888 = vrcp.f32 %v873_v48 }
 0xac6   :  { %v1889_v50 = vpop.eup %1888 }
 0xac7   :  { %v876_v51 = vmul.f32 %v1889_v50, %v867_v49  ;;  %v879_v56 = vsub.f32 1.0, %v1889_v50  ;;  %v885_v58 = vmul.f32 %v1889_v50, %v792_v36 }
 0xac9   :  { %v877_v52 = vadd.f32 %v876_v51, %v2362_v22 }
 0xacb   :  { %1890 = vtanh.f32 %v877_v52 }
 0xad5   :  { %v1891_v53 = vpop.eup %1890 }
 0xad6   :  { %881 = vrot.lane.b32.xlu0 %v1891_v53, %s2111_s6  ;;  %v1465_v53 = vld [vmem:[#allocation11] sm:$0xff] }
 0xb48   :  { %v882_v57 = vpop.permute.xlu0 %881 }
 0xb49   :  { %v884_v59 = vmul.f32 %v882_v57, %v879_v56  ;;  %v1466_v56 = vld [vmem:[#allocation11 + $0x8] sm:$0xff] }
 0xb4a   :  { %v1829_v57 = vpack.c.bf16 %v1466_v56, %v1465_v53 }
 0xb4b   :  { %v886_v60 = vadd.f32 %v885_v58, %v884_v59  ;;  %v1468_v58 = vld [vmem:[#allocation11 + $0x18] sm:$0xff] }
 0xb4c   :  { %1830 = vmatprep.subr.bf16.mxu1 %v1829_v57 }
 0xb4d   :  { %888 = vrot.lane.b32.xlu1 %v886_v60, %s2111_s6 }
 0xbbf   :  { %v2442_v61 = vpop.permute.xlu1 %888 }
 0xbc0   :  { %1611 = vmatmul.mubr.msk.f32.vlgmr.msra.gmra.mrb[8].mxu0 %vm418_vm3, %v2442_v61 }
 0xbc1   :  { %1816 = vmatpush1.bf16.msra.mxu0 %v2291_v32  ;;  %1144 = vmatprep.mubr.f32.mxu0 %v2110_v1 }
 0xbc2   :  { %1818 = vmatprep.subr.bf16.mxu0 %v2293_v34 }
 0xbc5   :  { %1820 = vmatpush1.bf16.msra.mxu0 %v2297_v39 }
 0xbc6   :  { %1822 = vmatprep.subr.bf16.mxu0 %v2301_v40 }
 0xbc9   :  { %1824 = vmatpush1.bf16.msra.mxu0 %v2304_v43 }
 0xbca   :  { %1826 = vmatprep.subr.bf16.mxu0 %v2308_v46 }
 0xbcd   :  { %1828 = vmatpush1.bf16.msra.mxu0 %v2311_v54 }
 0xc93   :  { %v958_v62 = vpop.f32.mrb[8].mxu0 }
 0xc94   :  { %v959_v63 = vadd.f32 %v958_v62, %v2351_v5  ;;  %v960_v3 = vpop.f32.mrb[9].mxu0 }
 0xc95   :  { %v961_v39 = vadd.f32 %v960_v3, %v2359_v16  ;;  %v1472_v3 = vld [vmem:[#allocation11 + $0x38] sm:$0xff] }
 0xc96   :  { %v963_v32 = vadd.f32 %v959_v63, %v2355_v9 }
 0xc98   :  { %v1612_v4 = vmul.f32 -1.442695, %v963_v32 }
 0xc9a   :  { %1892 = vpow2.f32 %v1612_v4 }
 0xca4   :  { %v1893_v1 = vpop.eup %1892 }
 0xca5   :  { %v967_v34 = vadd.f32 1.0, %v1893_v1 }
 0xca7   :  { %1894 = vrcp.f32 %v967_v34 }
 0xcb1   :  { %v1895_v40 = vpop.eup %1894 }
 0xcb2   :  { %v970_v6 = vmul.f32 %v1895_v40, %v961_v39  ;;  %v973_v54 = vsub.f32 1.0, %v1895_v40  ;;  %v979_v8 = vmul.f32 %v1895_v40, %v886_v60  ;;  %v1469_v60 = vld [vmem:[#allocation11 + $0x20] sm:$0xff]  ;;  %v2112_v40 = vmov 1966171168  }
 0xcb4   :  { %v971_v43 = vadd.f32 %v970_v6, %v2362_v22  ;;  %v1190_v6 = vunpack.c.l.s4 %v2112_v40 }
 0xcb6   :  { %1896 = vtanh.f32 %v971_v43  ;;  %v1191_v43 = vunpack.c.0.s8 %v1190_v6 }
 0xcc0   :  { %v1897_v46 = vpop.eup %1896 }
 0xcc1   :  { %975 = vrot.lane.b32.xlu0 %v1897_v46, %s2111_s6  ;;  %v2481_v46 = vsub.s32 %v1191_v43, %v2339_v0 }
 0xd33   :  { %v976_v7 = vpop.permute.xlu0 %975 }
 0xd34   :  { %v978_v10 = vmul.f32 %v976_v7, %v973_v54  ;;  %v1183_v54 = vsel %vm134_vm1, %v2424_v37, %v2442_v61  ;;  %v1184_v7 = vsel %vm134_vm1, %v2442_v61, %v2424_v37 }
 0xd36   :  { %v980_v11 = vadd.f32 %v979_v8, %v978_v10  ;;  %v1266_v8 = vrot.slane %v1183_v54, %v2481_v46  ;;  %v1289_v10 = vrot.slane %v1184_v7, %v2481_v46 }
 0xd38   :  { %982 = vrot.lane.b32.xlu1 %v980_v11, %s2111_s6 }
 0xdaa   :  { %v2460_v12 = vpop.permute.xlu1 %982 }
 0xdab   :  { %1613 = vmatmul.mubr.msk.f32.vlgmr.msra.gmra.mrb[8].mxu1 %vm418_vm3, %v2460_v12  ;;  %v1180_v0 = vsel %vm134_vm1, %v2405_v14, %v2460_v12 }
 0xdac   :  { %1832 = vmatpush3.bf16.msra.mxu1 %v1829_v57  ;;  %v1243_v61 = vrot.slane %v1180_v0, %v2481_v46 }
 0xe7e   :  { %v1052_v13 = vpop.f32.mrb[8].mxu1 }
 0xe7f   :  { %v1053_v15 = vadd.f32 %v1052_v13, %v2351_v5  ;;  %v1054_v18 = vpop.f32.mrb[9].mxu1  ;;  %v1185_v13 = vsel %vm134_vm1, %v2460_v12, %v2405_v14 }
 0xe80   :  { %v1055_v24 = vadd.f32 %v1054_v18, %v2359_v16  ;;  %v1290_v18 = vcombine.high %v1289_v10, %v1289_v10 }
 0xe81   :  { %v1057_v19 = vadd.f32 %v1053_v15, %v2355_v9  ;;  %v1267_v15 = vcombine.high %v1266_v8, %v1266_v8 }
 0xe83   :  { %v1614_v20 = vmul.f32 -1.442695, %v1057_v19  ;;  %v1312_v19 = vrot.slane %v1185_v13, %v2481_v46 }
 0xe85   :  { %1898 = vpow2.f32 %v1614_v20  ;;  %v1274_v20 = vrot.slane %v1266_v8, %v2481_v46 }
 0xe8f   :  { %v1899_v21 = vpop.eup %1898 }
 0xe90   :  { %v1061_v23 = vadd.f32 1.0, %v1899_v21  ;;  %v1281_v21 = vrot.slane %v1267_v15, %v2481_v46 }
 0xe92   :  { %1900 = vrcp.f32 %v1061_v23  ;;  %v1297_v23 = vrot.slane %v1289_v10, %v2481_v46 }
 0xe9c   :  { %v1901_v25 = vpop.eup %1900 }
 0xe9d   :  { %v1064_v26 = vmul.f32 %v1901_v25, %v1055_v24  ;;  %v1067_v29 = vsub.f32 1.0, %v1901_v25  ;;  %v1073_v31 = vmul.f32 %v1901_v25, %v980_v11  ;;  %v1304_v24 = vrot.slane %v1290_v18, %v2481_v46 }
 0xe9e   :  { %v1244_v25 = vcombine.high %v1243_v61, %v1243_v61 }
 0xe9f   :  { %v1065_v27 = vadd.f32 %v1064_v26, %v2362_v22  ;;  %v1313_v26 = vcombine.high %v1312_v19, %v1312_v19 }
 0xea1   :  { %1902 = vtanh.f32 %v1065_v27  ;;  %v1251_v27 = vrot.slane %v1243_v61, %v2481_v46 }
 0xeab   :  { %v1903_v28 = vpop.eup %1902 }
 0xeac   :  { %1069 = vrot.lane.b32.xlu0 %v1903_v28, %s2111_s6 }
 0xf1e   :  { %v1070_v17 = vpop.permute.xlu0 %1069 }
 0xf1f   :  { %v1072_v33 = vmul.f32 %v1070_v17, %v1067_v29  ;;  %v1397_v17 = vrot.slane %v1274_v20, %v2342_v2 }
 0xf21   :  { %v1074_v35 = vadd.f32 %v1073_v31, %v1072_v33  ;;  %v1401_v31 = vrot.slane %v1281_v21, %v2342_v2  ;;  %v1407_v33 = vrot.slane %v1297_v23, %v2342_v2 }
 0xf23   :  { %1076 = vrot.lane.b32.xlu1 %v1074_v35, %s2111_s6 }
 0xf95   :  { %v2470_v36 = vpop.permute.xlu1 %1076 }
 0xf96   :  { %1615 = vmatmul.mubr.msk.f32.vlgmr.msra.gmra.mrb[10].mxu0 %vm418_vm3, %v2470_v36  ;;  %v1177_v11 = vsel %vm134_vm1, %v2386_v55, %v2470_v36  ;;  %v1186_v14 = vsel %vm134_vm1, %v2470_v36, %v2386_v55  ;;  %v1320_v55 = vrot.slane %v1312_v19, %v2481_v46 }
 0xf97   :  { %v1220_v37 = vrot.slane %v1177_v11, %v2481_v46  ;;  %v1335_v29 = vrot.slane %v1186_v14, %v2481_v46 }
 0xf99   :  { %v1221_v12 = vcombine.high %v1220_v37, %v1220_v37  ;;  %v1228_v28 = vrot.slane %v1220_v37, %v2481_v46  ;;  %v1343_v57 = vrot.slane %v1335_v29, %v2481_v46 }
 0xf9b   :  { %v1235_v36 = vrot.slane %v1221_v12, %v2481_v46 }
0x1069   :  { %v1146_v38 = vpop.f32.mrb[10].mxu0 }
0x106a   :  { %v1147_v41 = vadd.f32 %v1146_v38, %v2351_v5  ;;  %v1148_v42 = vpop.f32.mrb[11].mxu0 }
0x106b   :  { %v1149_v49 = vadd.f32 %v1148_v42, %v2359_v16  ;;  %v1470_v16 = vld [vmem:[#allocation11 + $0x28] sm:$0xff] }
0x106c   :  { %v1151_v44 = vadd.f32 %v1147_v41, %v2355_v9  ;;  %v1467_v9 = vld [vmem:[#allocation11 + $0x10] sm:$0xff]  ;;  %v1837_v62 = vpack.c.bf16 %v1470_v16, %v1469_v60 }
0x106d   :  { %v1833_v59 = vpack.c.bf16 %v1468_v58, %v1467_v9 }
0x106e   :  { %v1616_v45 = vmul.f32 -1.442695, %v1151_v44  ;;  %v1258_v44 = vrot.slane %v1244_v25, %v2481_v46 }
0x106f   :  { %1834 = vmatprep.subr.bf16.mxu1 %v1833_v59 }
0x1070   :  { %1904 = vpow2.f32 %v1616_v45  ;;  %1836 = vmatpush3.bf16.msra.mxu1 %v1833_v59  ;;  %v1327_v45 = vrot.slane %v1313_v26, %v2481_v46  ;;  %v1391_v60 = vrot.slane %v1258_v44, %v2342_v2 }
0x1071   :  { %1838 = vmatprep.subr.bf16.mxu1 %v1837_v62 }
0x1074   :  { %1840 = vmatpush3.bf16.msra.mxu1 %v1837_v62 }
0x107a   :  { %v1905_v47 = vpop.eup %1904 }
0x107b   :  { %v1155_v48 = vadd.f32 1.0, %v1905_v47 }
0x107d   :  { %1906 = vrcp.f32 %v1155_v48 }
0x1087   :  { %v1907_v50 = vpop.eup %1906 }
0x1088   :  { %v1158_v51 = vmul.f32 %v1907_v50, %v1149_v49  ;;  %v1161_v63 = vsub.f32 1.0, %v1907_v50  ;;  %v1167_v1 = vmul.f32 %v1907_v50, %v1074_v35  ;;  %v1411_v35 = vrot.slane %v1304_v24, %v2342_v2 }
0x1089   :  { %v1387_v49 = vrot.slane %v1251_v27, %v2342_v2  ;;  %v1336_v50 = vcombine.high %v1335_v29, %v1335_v29 }
0x108a   :  { %v1159_v52 = vadd.f32 %v1158_v51, %v2362_v22  ;;  %v1471_v22 = vld [vmem:[#allocation11 + $0x30] sm:$0xff]  ;;  %v1377_v51 = vrot.slane %v1228_v28, %v2342_v2 }
0x108b   :  { %v1841_v4 = vpack.c.bf16 %v1472_v3, %v1471_v22  ;;  %v1350_v16 = vrot.slane %v1336_v50, %v2481_v46 }
0x108c   :  { %1908 = vtanh.f32 %v1159_v52 }
0x108d   :  { %1842 = vmatprep.subr.bf16.mxu1 %v1841_v4  ;;  %v1431_v43 = vrot.slane %v1350_v16, %v2342_v2 }
0x108e   :  { %1844 = vmatpush3.bf16.msra.mxu1 %v1841_v4 }
0x1096   :  { %v1909_v5 = vpop.eup %1908 }
0x1097   :  { %1163 = vrot.lane.b32.xlu0 %v1909_v5, %s2111_s6  ;;  %v1381_v5 = vrot.slane %v1235_v36, %v2342_v2 }
0x1109   :  { %v1164_v32 = vpop.permute.xlu0 %1163 }
0x110a   :  { %v1166_v34 = vmul.f32 %v1164_v32, %v1161_v63  ;;  %v1427_v32 = vrot.slane %v1343_v57, %v2342_v2 }
0x110c   :  { %v1168_v39 = vadd.f32 %v1167_v1, %v1166_v34  ;;  %v1421_v34 = vrot.slane %v1327_v45, %v2342_v2 }
0x110e   :  { %1171 = vrot.lane.b32.xlu1 %v1168_v39, %s2111_s6 }
0x1180   :  { %v1172_v38 = vpop.permute.xlu1 %1171 }
0x1181   :  { %v1174_v41 = vsel %vm134_vm1, %v2367_v30, %v1172_v38  ;;  %v1187_v42 = vsel %vm134_vm1, %v1172_v38, %v2367_v30  ;;  %v1417_v30 = vrot.slane %v1320_v55, %v2342_v2 }
0x1182   :  { %v1195_v47 = vrot.slane %v1174_v41, %v2481_v46  ;;  %v1358_v48 = vrot.slane %v1187_v42, %v2481_v46 }
0x1184   :  { %v1196_v52 = vcombine.high %v1195_v47, %v1195_v47  ;;  %v1203_v53 = vrot.slane %v1195_v47, %v2481_v46  ;;  %v1359_v56 = vcombine.high %v1358_v48, %v1358_v48  ;;  %v1366_v58 = vrot.slane %v1358_v48, %v2481_v46 }
0x1186   :  { %v1210_v9 = vrot.slane %v1196_v52, %v2481_v46  ;;  %v1445_v59 = vsel %vm1444_vm4, %v1203_v53, %v1377_v51  ;;  %v1373_v63 = vrot.slane %v1359_v56, %v2481_v46  ;;  %v1437_v39 = vrot.slane %v1366_v58, %v2342_v2 }
0x1187   :  { %v1448_v62 = vsel %vm1447_vm5, %v1445_v59, %v1387_v49 }
0x1188   :  { %v1446_v22 = vsel %vm1444_vm4, %v1210_v9, %v1381_v5  ;;  %v1451_v3 = vsel %vm1450_vm6, %v1448_v62, %v1397_v17  ;;  %v1441_v7 = vrot.slane %v1373_v63, %v2342_v2 }
0x1189   :  { %v1449_v4 = vsel %vm1447_vm5, %v1446_v22, %v1391_v60  ;;  %v1454_v1 = vsel %vm1453_vm7, %v1451_v3, %v1407_v33 }
0x118a   :  { %v1457_v40 = vsel %vm1456_vm8, %v1454_v1, %v1417_v30  ;;  %v1452_v6 = vsel %vm1450_vm6, %v1449_v4, %v1401_v31 }
0x118b   :  { %v1460_v46 = vsel %vm1459_vm9, %v1457_v40, %v1427_v32  ;;  %v1455_v54 = vsel %vm1453_vm7, %v1452_v6, %v1411_v35 }
0x118c   :  { %v1463_v8 = vsel %vm1462_vm10, %v1460_v46, %v1437_v39  ;;  %v1458_v10 = vsel %vm1456_vm8, %v1455_v54, %v1421_v34 }
0x118d   :  { %1678 = vmatprep.mubr.msk.f32.mxu1 %vm418_vm3, %v1463_v8  ;;  %v1461_v11 = vsel %vm1459_vm9, %v1458_v10, %v1431_v43 }
0x118e   :  { %v1464_v0 = vsel %vm1462_vm10, %v1461_v11, %v1441_v7 }
0x118f   :  { %1679 = vmatmul.mubr.msk.f32.vlgmr.msra.gmra.mrb[10].mxu1 %vm418_vm3, %v1464_v0 }
0x1190   :  { %2053 = shalt.err (!%p2050_p10)
}
0x1191   :  { %s2054_s17 = scalar_lea.hbm %s2599_s12, 32 }
0x1192   :  { %p2055_p11 = scmp.ne.s32.totalorder %s2599_s12, %s2054_s17  ;;  %p2058_p12 = scmp.lt.u32.totalorder %s2054_s17, %s2599_s12 }
0x1194   :  { %p2060_p13 = pnand %p2058_p12, %p2055_p11 }
0x1196   :  { %2063 = shalt.err (!%p2060_p13)
}
0x1197   :  { %1584 = dma.vmem_to_hbm [thread:$0]  %s1582_s30, 32, %s2599_s12, [#allocation15]   ;;  %v1617_v2 = vld [vmem:[%s2597_s10] ss:$0 sm:$0xff] }
0x1198   :  { %s2114_s27 = smov [#allocation13]  }
0x1199   :  { %s1568_s7 = sshll.u32 %s2114_s27, 4  ;;  %s1569_s7 = int_to_ptr.vmem [resolvable:$true] %s1568_s7 }
0x119a   :  { %s2064_s1 = scalar_lea.vmem %s1569_s7, 256  ;;  %p2069_p1 = scmp.lt.s32.totalorder %s1569_s7, %s1569_s7 }
0x119b   :  { %p2065_p0 = scmp.ne.s32.totalorder %s1569_s7, %s2064_s1  ;;  %p2070_p2 = scmp.lt.s32.totalorder %s2064_s1, %s2064_s1 }
0x119d   :  { %p2071_p3 = por %p2070_p2, %p2069_p1 }
0x119f   :  { %p2072_p4 = pnand %p2071_p3, %p2065_p0 }
0x1262   :  { %v1680_v13 = vpop.f32.mrb[10].mxu1 }
0x1263   :  { %v1558_v15 = vadd.f32 %v1680_v13, %v1617_v2  ;;  %v1552_v18 = vpop.f32.mrb[11].mxu1 }
0x1264   :  { %v1553_v37 = vadd.f32 %v1617_v2, %v1552_v18 }
0x1265   :  { %1562 = vst [vmem:[#allocation13 + $0x8] sm:$0xff] %v1558_v15 }
0x1266   :  { %1561 = vst [vmem:[#allocation13] sm:$0xff] %v1553_v37 }
0x1267   :  { %2075 = shalt.err (!%p2072_p4)
}
0x1268   :  { %s2076_s10 = scalar_lea.hbm %s2598_s11, 256 }
0x1269   :  { %p2077_p5 = scmp.ne.s32.totalorder %s2598_s11, %s2076_s10  ;;  %p2080_p6 = scmp.lt.u32.totalorder %s2076_s10, %s2598_s11 }
0x126b   :  { %p2082_p7 = pnand %p2080_p6, %p2077_p5 }
0x126d   :  { %2085 = shalt.err (!%p2082_p7)
}
0x126e   :  { %1574 = dma.vmem_to_hbm [thread:$0]  %s1569_s7, 256, %s2598_s11, [#allocation4], %s2099_s13, %s2099_s13, %s2100_s14  }
0x126f   :  { %2094 = dma.done.wait [#allocation4], 256  }
0x1270   :  { %2095 = vsyncadd [#allocation4], 4294967040 }
0x1271   :  { %2096 = dma.done.wait [#allocation15], 32  }
0x1272   :  { %2097 = vsyncadd [#allocation15], 4294967264 }
0x1273   :  { %1591 = vsyncpa [#allocation3], 1 }
0x1274   :  { %1592 = vsyncpa [#allocation6], 1 }
0x1275   :  { %1593 = vsyncpa [#allocation9], 1 }
0x1276   :  { %1594 = vsyncpa [#allocation12], 1 }
0x1277   :  { %1595 = vsyncpa [#allocation4], 1 }
0x1278   :  { %1596 = vsyncpa [#allocation15], 1 }

</bundles_post_ra>
